<compile_context>
chip_gen: v5e
topology: v5e:2x2
jax: 0.10.0
libtpu: 0.0.40
codegen_flags: <defaults>
</compile_context>

<pallas_src>
import functools

import jax
import jax.numpy as jnp
from jax.experimental import pallas as pl
from jax.experimental.pallas import tpu as pltpu


def _round_up(x, m):
    return ((x + m - 1) // m) * m


# --------------------------------------------------------------------------------------
# Fused Pallas kernel: shared MLP + AttentionInPnts (all stacks + softmax combine)
# --------------------------------------------------------------------------------------
def _fused_sa_attn_kernel(*refs, n_mlp, channel, n_near, act_dtype, c_pad):
    """refs = [g_ref (TM*K, Cin) bf16, c_ref (TM, Cin) bf16,
               (w_bf16, b_f32) * (n_mlp + 6),   # mlp..., fai(2), alpha||psi(2), gamma(2)
               o_ref (TM, c_pad) f32]"""
    g_ref, c_ref = refs[0], refs[1]
    o_ref = refs[-1]
    lrefs = refs[2:-1]
    tm = c_ref.shape[0]
    K = n_near

    def layer(x, idx, out_dtype=None):
        # BN scale is already folded into the bf16 weight -> dot + bias + ReLU only.
        w = lrefs[2 * idx][...]                 # (cin, cout) bf16
        b = lrefs[2 * idx + 1][...]             # (1, cout)   f32
        y = jnp.dot(x.astype(jnp.bfloat16), w, preferred_element_type=jnp.float32)
        dt = act_dtype if out_dtype is None else out_dtype
        return jnp.maximum(y.astype(dt) + b.astype(dt), 0.0)

    # Shared per-point MLP: one matmul per layer on the stacked [grouped ; center] rows
    # (identical weights -> a single MXU weight push / result drain per layer).
    x = jnp.concatenate([g_ref[...], c_ref[...]], axis=0)        # (TM*(K+1), Cin)
    for l in range(n_mlp):
        x = layer(x, l)
    xg = x[: tm * K]                                             # (TM*K, C) sublane-aligned view
    xc = x[tm * K:]                                              # (TM,   C)

    i0 = n_mlp
    fai = layer(layer(xc, i0 + 0), i0 + 1)                       # (TM, C)
    pa = layer(layer(xg, i0 + 2), i0 + 3)                        # (TM*K, 2C) = [alpha | psi]
    alpha = pa[:, :channel]                                      # lane-0 slice -> cheap view

    # (fai - psi) without slicing psi at lane C: subtract from the 128-wide pa directly.
    # The alpha lanes become (-alpha) and only hit the zero rows of the padded gamma-1 weight.
    fai_w = jnp.concatenate([jnp.zeros((tm, channel), fai.dtype), fai], axis=-1)   # (TM, 2C)
    diff = (fai_w[:, None, :] - pa.reshape(tm, K, 2 * channel)).reshape(tm * K, 2 * channel)

    gout = layer(layer(diff, i0 + 4), i0 + 5, out_dtype=jnp.float32)   # (TM*K, C) f32

    # softmax over the channel (lane) dim in f32; (channel / n_near) is folded into alpha-2.
    m = jnp.max(gout, axis=-1, keepdims=True)
    e = jnp.exp(gout - m)
    p = e * pl.reciprocal(jnp.sum(e, axis=-1, keepdims=True), approx=True)
    y = jnp.sum((p * alpha.astype(jnp.float32)).reshape(tm, K, channel), axis=1)   # (TM, C)

    # Lane-dense store: pad the last dim to a multiple of 128 so writeback is an unmasked vst.
    if c_pad != channel:
        y = jnp.concatenate([y, jnp.zeros((tm, c_pad - channel), y.dtype)], axis=-1)
    o_ref[...] = y.astype(o_ref.dtype)


def _elementwise_bf16_default():
    # v6e / v7x VPU+EUP are bf16-native; v5e (v5 lite) and older chips are not.
    try:
        kind = jax.devices()[0].device_kind.lower()
    except Exception:
        return False
    for tag in ("v5 lite", "v5lite", "v5e", "v4", "v3", "v2"):
        if tag in kind:
            return False
    return True


def _tile_config(mc):
    # v5e/v6e: 128 MiB VMEM -> tm up to 1024 with a ~96 MiB scoped limit.
    # v7x: 64 MiB VMEM per TensorCore -> cap at tm=512 / ~48 MiB and keep grid >= 2.
    try:
        vmem_cap = pltpu.get_tpu_info().vmem_capacity_bytes
    except Exception:
        vmem_cap = 64 * 1024 * 1024
    if vmem_cap >= 128 * 1024 * 1024:
        tm_max, vmem_limit = 1024, 96 * 1024 * 1024
    else:
        tm_max, vmem_limit = 512, 48 * 1024 * 1024
    full = _round_up(mc, 8)
    if full <= tm_max:
        # Prefer >= 2 blocks when there is enough work so ("parallel",) uses both v7x TCs.
        tm = full if mc <= 64 else _round_up((mc + 1) // 2, 8)
    else:
        tm = tm_max
    return tm, vmem_limit


def fused_sa_attention(g_fea2d, cfa2d, layers, *, n_mlp, channel, n_near,
                       act_dtype=jnp.float32):
    """g_fea2d: [Mc*K, Cin] (center-major grouped rows), cfa2d: [Mc, Cin].
    layers: list of (w [cin,cout] bf16 with BN scale folded, b [1,cout] f32).
    Returns y: [Mc, channel] f32."""
    mc, cin = cfa2d.shape
    K = n_near
    assert g_fea2d.shape == (mc * K, cin)

    tm, vmem_limit = _tile_config(mc)
    mc_pad = _round_up(mc, tm)
    c_pad = _round_up(channel, 128)

    # bf16 input streams: halve HBM->VMEM DMA + the input double-buffer footprint.
    g2 = g_fea2d.astype(jnp.bfloat16)
    c2 = cfa2d.astype(jnp.bfloat16)
    if mc_pad != mc:
        # Zero-pad so every block is full: no ragged tail, no stale-VMEM reads, no Inf/NaN.
        g2 = jnp.pad(g2, ((0, (mc_pad - mc) * K), (0, 0)))
        c2 = jnp.pad(c2, ((0, mc_pad - mc), (0, 0)))

    grid = (mc_pad // tm,)

    # Weights/biases are grid-invariant (constant index_map) so Pallas copies them in once.
    w_args, w_specs = [], []
    for (w, b) in layers:
        w_args += [w, b]
        w_specs += [pl.BlockSpec(w.shape, lambda i: (0, 0)),
                    pl.BlockSpec(b.shape, lambda i: (0, 0))]

    kernel = functools.partial(_fused_sa_attn_kernel, n_mlp=n_mlp, channel=channel,
                               n_near=n_near, act_dtype=act_dtype, c_pad=c_pad)
    out = pl.pallas_call(
        kernel,
        out_shape=jax.ShapeDtypeStruct((mc_pad, c_pad), jnp.float32),
        grid=grid,
        in_specs=[pl.BlockSpec((tm * K, cin), lambda i: (i, 0)),
                  pl.BlockSpec((tm, cin), lambda i: (i, 0))] + w_specs,
        out_specs=pl.BlockSpec((tm, c_pad), lambda i: (i, 0)),
        compiler_params=pltpu.CompilerParams(
            dimension_semantics=("parallel",),
            vmem_limit_bytes=vmem_limit),
    )(g2, c2, *w_args)
    return out[:mc, :channel]


# --------------------------------------------------------------------------------------
# Weight packing (BN scale folded into bf16 weights; alpha||psi fused; gamma-1 zero-padded)
# --------------------------------------------------------------------------------------
def _fold(lyr, extra=1.0):
    """Fold BN scale (and an optional positive scalar) into a bf16 weight + f32 bias row."""
    w = (lyr['w'] * lyr['scale'][None, :] * extra).astype(jnp.bfloat16)
    b = (lyr['bias'] * extra)[None, :].astype(jnp.float32)
    return w, b


def _pack_alpha_psi(alpha_layers, psi_layers, extra_alpha):
    # layer 1: concat along Cout as [alpha | psi] (alpha first -> free lane-0 slice in-kernel).
    aw1, ab1 = _fold(alpha_layers[0])
    pw1, pb1 = _fold(psi_layers[0])
    w1 = jnp.concatenate([aw1, pw1], axis=1)
    b1 = jnp.concatenate([ab1, pb1], axis=1)
    # layer 2: block-diagonal so the heads stay independent; channel/n_near folded into alpha
    # (valid since ReLU(c*x) = c*ReLU(x) for c > 0).
    aw2, ab2 = _fold(alpha_layers[1], extra_alpha)
    pw2, pb2 = _fold(psi_layers[1])
    ha, ca = aw2.shape
    hp, cp = pw2.shape
    w2 = jnp.zeros((ha + hp, ca + cp), jnp.bfloat16)
    w2 = w2.at[:ha, :ca].set(aw2).at[ha:, ca:].set(pw2)
    b2 = jnp.concatenate([ab2, pb2], axis=1)
    return [(w1, b1), (w2, b2)]


def _pack_gamma(gamma_layers, channel):
    # layer 1: zero-pad the contraction dim so it consumes the 128-wide (-alpha | fai-psi)
    # tensor directly; the alpha lanes hit zero rows and contribute exactly nothing.
    gw1, gb1 = _fold(gamma_layers[0])
    cin, cout = gw1.shape
    w1 = jnp.zeros((channel + cin, cout), jnp.bfloat16).at[channel:, :].set(gw1)
    w2, b2 = _fold(gamma_layers[1])
    return [(w1, gb1), (w2, b2)]


# --------------------------------------------------------------------------------------
# Pure-JAX reference for the fused region (same folded/bf16 numerics as the kernel)
# --------------------------------------------------------------------------------------
def _lin_ref(x, lyr, act_dt, extra=1.0):
    w = (lyr['w'] * lyr['scale'][None, :] * extra).astype(jnp.bfloat16)
    b = (lyr['bias'] * extra).astype(jnp.float32)
    y = jnp.dot(x.astype(jnp.bfloat16), w, preferred_element_type=jnp.float32)
    return jnp.maximum(y.astype(act_dt) + b.astype(act_dt), 0.0)


def _attention_ref(params, x_g, x_c, channel, n_near, act_dt):
    for lyr in params['mlp']:
        x_g = _lin_ref(x_g, lyr, act_dt)
        x_c = _lin_ref(x_c, lyr, act_dt)
    fai = _lin_ref(_lin_ref(x_c, params['fai'][0], act_dt), params['fai'][1], act_dt)
    psi = _lin_ref(_lin_ref(x_g, params['psi'][0], act_dt), params['psi'][1], act_dt)
    a1 = _lin_ref(x_g, params['alpha'][0], act_dt)
    alpha = _lin_ref(a1, params['alpha'][1], act_dt, extra=float(channel) / float(n_near))
    mc = x_c.shape[0]
    diff = (fai[:, None, :] - psi.reshape(mc, n_near, channel)).reshape(-1, channel)
    gout = _lin_ref(_lin_ref(diff, params['gamma'][0], act_dt), params['gamma'][1],
                    jnp.float32)
    p = jax.nn.softmax(gout, axis=-1)
    y = p * alpha.astype(jnp.float32)
    return jnp.sum(y.reshape(mc, n_near, channel), axis=1)


# --------------------------------------------------------------------------------------
# Glue (plain JAX): kNN, FPS, gathers — data-dependent indexing, not a Pallas hot path
# --------------------------------------------------------------------------------------
def get_neighbor_index(xyz, k):
    inner = jnp.einsum('bnc,bmc->bnm', xyz, xyz)
    sq = jnp.sum(xyz * xyz, axis=-1)
    dist = sq[:, :, None] - 2.0 * inner + sq[:, None, :]
    _, idx = jax.lax.top_k(-dist, k)
    return idx


def index_points(points, idx):
    return jax.vmap(lambda p, i: p[i])(points, idx)


def farthest_point_sample(xyz, n_samples):
    B, N, _ = xyz.shape

    def body(i, state):
        centroids, distance, farthest = state
        centroids = centroids.at[:, i].set(farthest)
        centroid = index_points(xyz, farthest[:, None])          # [B, 1, 3]
        dist = jnp.sum((xyz - centroid) ** 2, axis=-1)           # [B, N]
        distance = jnp.minimum(distance, dist)
        farthest = jnp.argmax(distance, axis=-1).astype(jnp.int32)
        return centroids, distance, farthest

    init = (jnp.zeros((B, n_samples), jnp.int32),
            jnp.full((B, N), 1e10, jnp.float32),
            jnp.zeros((B,), jnp.int32))
    centroids, _, _ = jax.lax.fori_loop(0, n_samples, body, init)
    return centroids


# --------------------------------------------------------------------------------------
# Deterministic parameter init (Conv2d 1x1 weight/bias + eval-mode BatchNorm2d, folded)
# --------------------------------------------------------------------------------------
def init_conv_bn(key, cin, cout):
    k = jax.random.split(key, 4)
    w = jax.random.normal(k[0], (cin, cout), jnp.float32) / jnp.sqrt(cin)
    b = 0.01 * jax.random.normal(k[1], (cout,), jnp.float32)
    gamma = 1.0 + 0.1 * jax.random.normal(k[2], (cout,), jnp.float32)
    beta = 0.1 * jax.random.normal(k[3], (cout,), jnp.float32)
    r_mean = jnp.zeros((cout,), jnp.float32)
    r_var = jnp.ones((cout,), jnp.float32)
    eps = 1e-5
    scale = gamma / jnp.sqrt(r_var + eps)
    bias = (b - r_mean) * scale + beta
    return dict(w=w, scale=scale, bias=bias)


def init_fc_conv2d(key, channels):
    keys = jax.random.split(key, len(channels) - 1)
    return [init_conv_bn(keys[i], channels[i], channels[i + 1])
            for i in range(len(channels) - 1)]


def init_set_abstraction(key, in_channel, mlp):
    keys = jax.random.split(key, 5)
    last = in_channel
    mlp_layers = []
    mkeys = jax.random.split(keys[0], len(mlp))
    for i, out_c in enumerate(mlp):
        mlp_layers.append(init_conv_bn(mkeys[i], last, out_c))
        last = out_c
    ch = last
    return dict(
        mlp=mlp_layers,
        fai=init_fc_conv2d(keys[1], [ch, ch + 8, ch]),
        psi=init_fc_conv2d(keys[2], [ch, ch + 8, ch]),
        alpha=init_fc_conv2d(keys[3], [ch, ch + 8, ch]),
        gamma=init_fc_conv2d(keys[4], [ch, ch + 8, ch]),
    )


# --------------------------------------------------------------------------------------
# SetAbstraction forward (group_all=False path, which also exercises AttentionInPnts)
# --------------------------------------------------------------------------------------
def set_abstraction_forward(params, xyz, eula, near, meta, fea,
                            n_center, n_near, use_pallas=True, act_dtype=None):
    B, N, _ = xyz.shape
    S, K = n_center, n_near

    # ---- sample_and_group ----
    idx_all = get_neighbor_index(xyz, K)                  # [B, N, K]
    fps_idx = farthest_point_sample(xyz, S)               # [B, S]
    center_xyz = index_points(xyz, fps_idx)               # [B, S, 3]
    center_eula = index_points(eula, fps_idx)
    center_near = index_points(near, fps_idx)
    center_meta = index_points(meta, fps_idx)
    idx = index_points(idx_all, fps_idx)                  # [B, S, K]
    g_xyz = index_points(xyz, idx)                        # [B, S, K, 3]
    g_eula = index_points(eula, idx)
    g_near = index_points(near, idx)
    g_meta = index_points(meta, idx)
    g_fea_pts = index_points(fea, idx)
    center_fea = index_points(fea, fps_idx)               # [B, S, D]

    g_xyz_rel = g_xyz - center_xyz[:, :, None, :]
    g_eula_rel = g_eula - center_eula[:, :, None, :]
    g_near_cat = jnp.concatenate(
        [g_near, jnp.broadcast_to(center_near[:, :, None, :], g_near.shape)], axis=-1)
    g_meta_cat = jnp.concatenate(
        [g_meta, jnp.broadcast_to(center_meta[:, :, None, :], g_meta.shape)], axis=-1)
    g_fea = jnp.concatenate(
        [g_xyz_rel, g_eula_rel, g_near_cat, g_meta_cat, g_fea_pts], axis=-1)  # [B,S,K,Cin]

    # center features fed through the same shared conv/bn stack
    cfa = jnp.concatenate(
        [jnp.zeros_like(center_xyz), jnp.zeros_like(center_eula),
         jnp.tile(center_near, (1, 1, 2)), jnp.tile(center_meta, (1, 1, 2)),
         center_fea], axis=-1)                                                 # [B,S,Cin]

    Cin = g_fea.shape[-1]
    x_g = g_fea.reshape(B * S * K, Cin)
    x_c = cfa.reshape(B * S, Cin)
    C = params['mlp'][-1]['w'].shape[1]

    if act_dtype is None:
        act_dtype = jnp.bfloat16 if _elementwise_bf16_default() else jnp.float32

    if use_pallas:
        layers = ([_fold(l) for l in params['mlp']]
                  + [_fold(l) for l in params['fai']]
                  + _pack_alpha_psi(params['alpha'], params['psi'], float(C) / float(K))
                  + _pack_gamma(params['gamma'], C))
        y = fused_sa_attention(x_g, x_c, layers, n_mlp=len(params['mlp']),
                               channel=C, n_near=K, act_dtype=act_dtype)
    else:
        y = _attention_ref(params, x_g, x_c, C, K, act_dtype)

    y = y.reshape(B, S, C)                                 # == torch permute(0,2,1)
    new_fea = jnp.concatenate([center_fea, y], axis=-1)    # [B, S, D + C]
    return center_xyz, center_eula, center_near, center_meta, new_fea


# --------------------------------------------------------------------------------------
if __name__ == "__main__":
    B, N = 2, 32
    n_center, n_near = 8, 8
    c_near, c_meta, D = 2, 4, 14
    in_channel = 3 + 3 + 2 * c_near + 2 * c_meta + D       # 32
    mlp = [32, 64]

    key = jax.random.PRNGKey(0)
    keys = jax.random.split(key, 6)
    xyz = jax.random.normal(keys[0], (B, N, 3), jnp.float32)
    eula = jax.random.normal(keys[1], (B, N, 3), jnp.float32)
    near = jax.random.normal(keys[2], (B, N, c_near), jnp.float32)
    meta = jax.random.normal(keys[3], (B, N, c_meta), jnp.float32)
    fea = jax.random.normal(keys[4], (B, N, D), jnp.float32)

    params = init_set_abstraction(keys[5], in_channel, mlp)

    out_pallas = set_abstraction_forward(params, xyz, eula, near, meta, fea,
                                         n_center, n_near, use_pallas=True)
    jax.block_until_ready(out_pallas)

    out_ref = set_abstraction_forward(params, xyz, eula, near, meta, fea,
                                      n_center, n_near, use_pallas=False)
    jax.block_until_ready(out_ref)

    assert out_pallas[4].shape == (B, n_center, D + mlp[-1]), out_pallas[4].shape
    diff = float(jnp.max(jnp.abs(out_pallas[4] - out_ref[4])))
    scale = float(jnp.max(jnp.abs(out_ref[4])))
    assert diff <= 1e-2 + 1e-2 * scale, f"Pallas vs reference mismatch: {diff} (scale {scale})"
    print("KERNEL_OK")
</pallas_src>

<mosaic_0001>
module attributes {stable_mosaic.version = 11 : i64} {
  func.func @_fused_sa_attn_kernel(%arg0: i32, %arg1: memref<128x32xbf16, #tpu.memory_space<vmem>>, %arg2: memref<16x32xbf16, #tpu.memory_space<vmem>>, %arg3: memref<32x32xbf16, #tpu.memory_space<vmem>>, %arg4: memref<1x32xf32, #tpu.memory_space<vmem>>, %arg5: memref<32x64xbf16, #tpu.memory_space<vmem>>, %arg6: memref<1x64xf32, #tpu.memory_space<vmem>>, %arg7: memref<64x72xbf16, #tpu.memory_space<vmem>>, %arg8: memref<1x72xf32, #tpu.memory_space<vmem>>, %arg9: memref<72x64xbf16, #tpu.memory_space<vmem>>, %arg10: memref<1x64xf32, #tpu.memory_space<vmem>>, %arg11: memref<64x144xbf16, #tpu.memory_space<vmem>>, %arg12: memref<1x144xf32, #tpu.memory_space<vmem>>, %arg13: memref<144x128xbf16, #tpu.memory_space<vmem>>, %arg14: memref<1x128xf32, #tpu.memory_space<vmem>>, %arg15: memref<128x72xbf16, #tpu.memory_space<vmem>>, %arg16: memref<1x72xf32, #tpu.memory_space<vmem>>, %arg17: memref<72x64xbf16, #tpu.memory_space<vmem>>, %arg18: memref<1x64xf32, #tpu.memory_space<vmem>>, %arg19: memref<16x128xf32, #tpu.memory_space<vmem>>) attributes {dimension_semantics = [#tpu.dimension_semantics<parallel>], iteration_bounds = array<i64: 1>, scalar_prefetch = 0 : i64, scratch_operands = 0 : i64, tpu.core_type = #tpu.core_type<tc>, window_params = [{transform_indices = @transform_0, window_bounds = array<i64: 128, 32>}, {transform_indices = @transform_1, window_bounds = array<i64: 16, 32>}, {pipeline_mode = #tpu.pipeline_mode<synchronous>, transform_indices = @transform_2, window_bounds = array<i64: 32, 32>}, {pipeline_mode = #tpu.pipeline_mode<synchronous>, transform_indices = @transform_3, window_bounds = array<i64: 1, 32>}, {pipeline_mode = #tpu.pipeline_mode<synchronous>, transform_indices = @transform_4, window_bounds = array<i64: 32, 64>}, {pipeline_mode = #tpu.pipeline_mode<synchronous>, transform_indices = @transform_5, window_bounds = array<i64: 1, 64>}, {pipeline_mode = #tpu.pipeline_mode<synchronous>, transform_indices = @transform_6, window_bounds = array<i64: 64, 72>}, {pipeline_mode = #tpu.pipeline_mode<synchronous>, transform_indices = @transform_7, window_bounds = array<i64: 1, 72>}, {pipeline_mode = #tpu.pipeline_mode<synchronous>, transform_indices = @transform_8, window_bounds = array<i64: 72, 64>}, {pipeline_mode = #tpu.pipeline_mode<synchronous>, transform_indices = @transform_9, window_bounds = array<i64: 1, 64>}, {pipeline_mode = #tpu.pipeline_mode<synchronous>, transform_indices = @transform_10, window_bounds = array<i64: 64, 144>}, {pipeline_mode = #tpu.pipeline_mode<synchronous>, transform_indices = @transform_11, window_bounds = array<i64: 1, 144>}, {pipeline_mode = #tpu.pipeline_mode<synchronous>, transform_indices = @transform_12, window_bounds = array<i64: 144, 128>}, {pipeline_mode = #tpu.pipeline_mode<synchronous>, transform_indices = @transform_13, window_bounds = array<i64: 1, 128>}, {pipeline_mode = #tpu.pipeline_mode<synchronous>, transform_indices = @transform_14, window_bounds = array<i64: 128, 72>}, {pipeline_mode = #tpu.pipeline_mode<synchronous>, transform_indices = @transform_15, window_bounds = array<i64: 1, 72>}, {pipeline_mode = #tpu.pipeline_mode<synchronous>, transform_indices = @transform_16, window_bounds = array<i64: 72, 64>}, {pipeline_mode = #tpu.pipeline_mode<synchronous>, transform_indices = @transform_17, window_bounds = array<i64: 1, 64>}, {transform_indices = @transform_18, window_bounds = array<i64: 16, 128>}]} {
    %c0 = arith.constant 0 : index
    %c0_0 = arith.constant 0 : index
    %0 = vector.load %arg1[%c0, %c0_0] : memref<128x32xbf16, #tpu.memory_space<vmem>>, vector<128x32xbf16>
    %c0_1 = arith.constant 0 : index
    %c0_2 = arith.constant 0 : index
    %1 = vector.load %arg2[%c0_1, %c0_2] : memref<16x32xbf16, #tpu.memory_space<vmem>>, vector<16x32xbf16>
    %2 = tpu.concatenate %0, %1 in 0 : vector<128x32xbf16>, vector<16x32xbf16> -> vector<144x32xbf16>
    %c0_3 = arith.constant 0 : index
    %c0_4 = arith.constant 0 : index
    %3 = vector.load %arg3[%c0_3, %c0_4] : memref<32x32xbf16, #tpu.memory_space<vmem>>, vector<32x32xbf16>
    %c0_5 = arith.constant 0 : index
    %c0_6 = arith.constant 0 : index
    %4 = vector.load %arg4[%c0_5, %c0_6] : memref<1x32xf32, #tpu.memory_space<vmem>>, vector<1x32xf32>
    %cst = arith.constant dense<0.000000e+00> : vector<144x32xf32>
    %5 = tpu.matmul %2, %3, %cst {dimension_numbers = #tpu.dot_dimension_numbers<[1], [0], [0], [1], [0, 0, 1, 1], [], []>} : vector<144x32xbf16>, vector<32x32xbf16>, vector<144x32xf32> -> vector<144x32xf32>
    %6 = arith.truncf %5 : vector<144x32xf32> to vector<144x32xbf16>
    %7 = arith.truncf %4 : vector<1x32xf32> to vector<1x32xbf16>
    %8 = vector.broadcast %7 : vector<1x32xbf16> to vector<144x32xbf16>
    %9 = arith.addf %6, %8 : vector<144x32xbf16>
    %cst_7 = arith.constant 0.000000e+00 : bf16
    %10 = vector.broadcast %cst_7 : bf16 to vector<144x32xbf16>
    %11 = arith.maximumf %9, %10 : vector<144x32xbf16>
    %c0_8 = arith.constant 0 : index
    %c0_9 = arith.constant 0 : index
    %12 = vector.load %arg5[%c0_8, %c0_9] : memref<32x64xbf16, #tpu.memory_space<vmem>>, vector<32x64xbf16>
    %c0_10 = arith.constant 0 : index
    %c0_11 = arith.constant 0 : index
    %13 = vector.load %arg6[%c0_10, %c0_11] : memref<1x64xf32, #tpu.memory_space<vmem>>, vector<1x64xf32>
    %cst_12 = arith.constant dense<0.000000e+00> : vector<144x64xf32>
    %14 = tpu.matmul %11, %12, %cst_12 {dimension_numbers = #tpu.dot_dimension_numbers<[1], [0], [0], [1], [0, 0, 1, 1], [], []>} : vector<144x32xbf16>, vector<32x64xbf16>, vector<144x64xf32> -> vector<144x64xf32>
    %15 = arith.truncf %14 : vector<144x64xf32> to vector<144x64xbf16>
    %16 = arith.truncf %13 : vector<1x64xf32> to vector<1x64xbf16>
    %17 = vector.broadcast %16 : vector<1x64xbf16> to vector<144x64xbf16>
    %18 = arith.addf %15, %17 : vector<144x64xbf16>
    %cst_13 = arith.constant 0.000000e+00 : bf16
    %19 = vector.broadcast %cst_13 : bf16 to vector<144x64xbf16>
    %20 = arith.maximumf %18, %19 : vector<144x64xbf16>
    %21 = vector.extract_strided_slice %20 {offsets = [0, 0], sizes = [128, 64], strides = [1, 1]} : vector<144x64xbf16> to vector<128x64xbf16>
    %22 = vector.extract_strided_slice %20 {offsets = [128, 0], sizes = [16, 64], strides = [1, 1]} : vector<144x64xbf16> to vector<16x64xbf16>
    %c0_14 = arith.constant 0 : index
    %c0_15 = arith.constant 0 : index
    %23 = vector.load %arg7[%c0_14, %c0_15] : memref<64x72xbf16, #tpu.memory_space<vmem>>, vector<64x72xbf16>
    %c0_16 = arith.constant 0 : index
    %c0_17 = arith.constant 0 : index
    %24 = vector.load %arg8[%c0_16, %c0_17] : memref<1x72xf32, #tpu.memory_space<vmem>>, vector<1x72xf32>
    %cst_18 = arith.constant dense<0.000000e+00> : vector<16x72xf32>
    %25 = tpu.matmul %22, %23, %cst_18 {dimension_numbers = #tpu.dot_dimension_numbers<[1], [0], [0], [1], [0, 0, 1, 1], [], []>} : vector<16x64xbf16>, vector<64x72xbf16>, vector<16x72xf32> -> vector<16x72xf32>
    %26 = arith.truncf %25 : vector<16x72xf32> to vector<16x72xbf16>
    %27 = arith.truncf %24 : vector<1x72xf32> to vector<1x72xbf16>
    %28 = vector.broadcast %27 : vector<1x72xbf16> to vector<16x72xbf16>
    %29 = arith.addf %26, %28 : vector<16x72xbf16>
    %cst_19 = arith.constant 0.000000e+00 : bf16
    %30 = vector.broadcast %cst_19 : bf16 to vector<16x72xbf16>
    %31 = arith.maximumf %29, %30 : vector<16x72xbf16>
    %c0_20 = arith.constant 0 : index
    %c0_21 = arith.constant 0 : index
    %32 = vector.load %arg9[%c0_20, %c0_21] : memref<72x64xbf16, #tpu.memory_space<vmem>>, vector<72x64xbf16>
    %c0_22 = arith.constant 0 : index
    %c0_23 = arith.constant 0 : index
    %33 = vector.load %arg10[%c0_22, %c0_23] : memref<1x64xf32, #tpu.memory_space<vmem>>, vector<1x64xf32>
    %cst_24 = arith.constant dense<0.000000e+00> : vector<16x64xf32>
    %34 = tpu.matmul %31, %32, %cst_24 {dimension_numbers = #tpu.dot_dimension_numbers<[1], [0], [0], [1], [0, 0, 1, 1], [], []>} : vector<16x72xbf16>, vector<72x64xbf16>, vector<16x64xf32> -> vector<16x64xf32>
    %35 = arith.truncf %34 : vector<16x64xf32> to vector<16x64xbf16>
    %36 = arith.truncf %33 : vector<1x64xf32> to vector<1x64xbf16>
    %37 = vector.broadcast %36 : vector<1x64xbf16> to vector<16x64xbf16>
    %38 = arith.addf %35, %37 : vector<16x64xbf16>
    %cst_25 = arith.constant 0.000000e+00 : bf16
    %39 = vector.broadcast %cst_25 : bf16 to vector<16x64xbf16>
    %40 = arith.maximumf %38, %39 : vector<16x64xbf16>
    %c0_26 = arith.constant 0 : index
    %c0_27 = arith.constant 0 : index
    %41 = vector.load %arg11[%c0_26, %c0_27] : memref<64x144xbf16, #tpu.memory_space<vmem>>, vector<64x144xbf16>
    %c0_28 = arith.constant 0 : index
    %c0_29 = arith.constant 0 : index
    %42 = vector.load %arg12[%c0_28, %c0_29] : memref<1x144xf32, #tpu.memory_space<vmem>>, vector<1x144xf32>
    %cst_30 = arith.constant dense<0.000000e+00> : vector<128x144xf32>
    %43 = tpu.matmul %21, %41, %cst_30 {dimension_numbers = #tpu.dot_dimension_numbers<[1], [0], [0], [1], [0, 0, 1, 1], [], []>} : vector<128x64xbf16>, vector<64x144xbf16>, vector<128x144xf32> -> vector<128x144xf32>
    %44 = arith.truncf %43 : vector<128x144xf32> to vector<128x144xbf16>
    %45 = arith.truncf %42 : vector<1x144xf32> to vector<1x144xbf16>
    %46 = vector.broadcast %45 : vector<1x144xbf16> to vector<128x144xbf16>
    %47 = arith.addf %44, %46 : vector<128x144xbf16>
    %cst_31 = arith.constant 0.000000e+00 : bf16
    %48 = vector.broadcast %cst_31 : bf16 to vector<128x144xbf16>
    %49 = arith.maximumf %47, %48 : vector<128x144xbf16>
    %c0_32 = arith.constant 0 : index
    %c0_33 = arith.constant 0 : index
    %50 = vector.load %arg13[%c0_32, %c0_33] : memref<144x128xbf16, #tpu.memory_space<vmem>>, vector<144x128xbf16>
    %c0_34 = arith.constant 0 : index
    %c0_35 = arith.constant 0 : index
    %51 = vector.load %arg14[%c0_34, %c0_35] : memref<1x128xf32, #tpu.memory_space<vmem>>, vector<1x128xf32>
    %cst_36 = arith.constant dense<0.000000e+00> : vector<128x128xf32>
    %52 = tpu.matmul %49, %50, %cst_36 {dimension_numbers = #tpu.dot_dimension_numbers<[1], [0], [0], [1], [0, 0, 1, 1], [], []>} : vector<128x144xbf16>, vector<144x128xbf16>, vector<128x128xf32> -> vector<128x128xf32>
    %53 = arith.truncf %52 : vector<128x128xf32> to vector<128x128xbf16>
    %54 = arith.truncf %51 : vector<1x128xf32> to vector<1x128xbf16>
    %55 = vector.broadcast %54 : vector<1x128xbf16> to vector<128x128xbf16>
    %56 = arith.addf %53, %55 : vector<128x128xbf16>
    %cst_37 = arith.constant 0.000000e+00 : bf16
    %57 = vector.broadcast %cst_37 : bf16 to vector<128x128xbf16>
    %58 = arith.maximumf %56, %57 : vector<128x128xbf16>
    %59 = vector.extract_strided_slice %58 {offsets = [0, 0], sizes = [128, 64], strides = [1, 1]} : vector<128x128xbf16> to vector<128x64xbf16>
    %cst_38 = arith.constant 0.000000e+00 : bf16
    %60 = vector.broadcast %cst_38 : bf16 to vector<16x64xbf16>
    %61 = tpu.concatenate %60, %40 in 1 : vector<16x64xbf16>, vector<16x64xbf16> -> vector<16x128xbf16>
    %62 = vector.shape_cast %61 : vector<16x128xbf16> to vector<16x1x128xbf16>
    %63 = vector.shape_cast %58 : vector<128x128xbf16> to vector<16x8x128xbf16>
    %64 = vector.broadcast %62 : vector<16x1x128xbf16> to vector<16x8x128xbf16>
    %65 = arith.subf %64, %63 : vector<16x8x128xbf16>
    %66 = vector.shape_cast %65 : vector<16x8x128xbf16> to vector<128x128xbf16>
    %c0_39 = arith.constant 0 : index
    %c0_40 = arith.constant 0 : index
    %67 = vector.load %arg15[%c0_39, %c0_40] : memref<128x72xbf16, #tpu.memory_space<vmem>>, vector<128x72xbf16>
    %c0_41 = arith.constant 0 : index
    %c0_42 = arith.constant 0 : index
    %68 = vector.load %arg16[%c0_41, %c0_42] : memref<1x72xf32, #tpu.memory_space<vmem>>, vector<1x72xf32>
    %cst_43 = arith.constant dense<0.000000e+00> : vector<128x72xf32>
    %69 = tpu.matmul %66, %67, %cst_43 {dimension_numbers = #tpu.dot_dimension_numbers<[1], [0], [0], [1], [0, 0, 1, 1], [], []>} : vector<128x128xbf16>, vector<128x72xbf16>, vector<128x72xf32> -> vector<128x72xf32>
    %70 = arith.truncf %69 : vector<128x72xf32> to vector<128x72xbf16>
    %71 = arith.truncf %68 : vector<1x72xf32> to vector<1x72xbf16>
    %72 = vector.broadcast %71 : vector<1x72xbf16> to vector<128x72xbf16>
    %73 = arith.addf %70, %72 : vector<128x72xbf16>
    %cst_44 = arith.constant 0.000000e+00 : bf16
    %74 = vector.broadcast %cst_44 : bf16 to vector<128x72xbf16>
    %75 = arith.maximumf %73, %74 : vector<128x72xbf16>
    %c0_45 = arith.constant 0 : index
    %c0_46 = arith.constant 0 : index
    %76 = vector.load %arg17[%c0_45, %c0_46] : memref<72x64xbf16, #tpu.memory_space<vmem>>, vector<72x64xbf16>
    %c0_47 = arith.constant 0 : index
    %c0_48 = arith.constant 0 : index
    %77 = vector.load %arg18[%c0_47, %c0_48] : memref<1x64xf32, #tpu.memory_space<vmem>>, vector<1x64xf32>
    %cst_49 = arith.constant dense<0.000000e+00> : vector<128x64xf32>
    %78 = tpu.matmul %75, %76, %cst_49 {dimension_numbers = #tpu.dot_dimension_numbers<[1], [0], [0], [1], [0, 0, 1, 1], [], []>} : vector<128x72xbf16>, vector<72x64xbf16>, vector<128x64xf32> -> vector<128x64xf32>
    %79 = vector.broadcast %77 : vector<1x64xf32> to vector<128x64xf32>
    %80 = arith.addf %78, %79 : vector<128x64xf32>
    %cst_50 = arith.constant 0.000000e+00 : f32
    %81 = vector.broadcast %cst_50 : f32 to vector<128x64xf32>
    %82 = arith.maximumf %80, %81 : vector<128x64xf32>
    %cst_51 = arith.constant dense<0xFF800000> : vector<128xf32>
    %83 = vector.multi_reduction <maximumf>, %82, %cst_51 [1] : vector<128x64xf32> to vector<128xf32>
    %84 = vector.shape_cast %83 : vector<128xf32> to vector<128x1xf32>
    %85 = vector.broadcast %84 : vector<128x1xf32> to vector<128x64xf32>
    %86 = arith.subf %82, %85 : vector<128x64xf32>
    %87 = math.exp %86 : vector<128x64xf32>
    %cst_52 = arith.constant dense<0.000000e+00> : vector<128xf32>
    %88 = vector.multi_reduction <add>, %87, %cst_52 [1] : vector<128x64xf32> to vector<128xf32>
    %89 = vector.shape_cast %88 : vector<128xf32> to vector<128x1xf32>
    %90 = tpu.reciprocal %89 {approx = true} : vector<128x1xf32> -> vector<128x1xf32>
    %91 = vector.broadcast %90 : vector<128x1xf32> to vector<128x64xf32>
    %92 = arith.mulf %87, %91 : vector<128x64xf32>
    %93 = arith.extf %59 : vector<128x64xbf16> to vector<128x64xf32>
    %94 = arith.mulf %92, %93 : vector<128x64xf32>
    %95 = vector.shape_cast %94 : vector<128x64xf32> to vector<16x8x64xf32>
    %cst_53 = arith.constant dense<0.000000e+00> : vector<16x64xf32>
    %96 = vector.multi_reduction <add>, %95, %cst_53 [1] : vector<16x8x64xf32> to vector<16x64xf32>
    %cst_54 = arith.constant 0.000000e+00 : f32
    %97 = vector.broadcast %cst_54 : f32 to vector<16x64xf32>
    %98 = tpu.concatenate %96, %97 in 1 : vector<16x64xf32>, vector<16x64xf32> -> vector<16x128xf32>
    %c0_55 = arith.constant 0 : index
    %c0_56 = arith.constant 0 : index
    %99 = vector.load %arg19[%c0_55, %c0_56] : memref<16x128xf32, #tpu.memory_space<vmem>>, vector<16x128xf32>
    tpu.vector_store %arg19[%c0_55, %c0_56], %98 {strides = array<i32>} : memref<16x128xf32, #tpu.memory_space<vmem>>, vector<16x128xf32>,
    return
  }
  func.func @transform_0(%arg0: i32) -> (i32, i32) {
    %c0_i32 = arith.constant 0 : i32
    %c0_i32_0 = arith.constant 0 : i32
    return %arg0, %c0_i32 : i32, i32
  }
  func.func @transform_1(%arg0: i32) -> (i32, i32) {
    %c0_i32 = arith.constant 0 : i32
    %c0_i32_0 = arith.constant 0 : i32
    return %arg0, %c0_i32 : i32, i32
  }
  func.func @transform_2(%arg0: i32) -> (i32, i32) {
    %c0_i32 = arith.constant 0 : i32
    %c0_i32_0 = arith.constant 0 : i32
    %c0_i32_1 = arith.constant 0 : i32
    return %c0_i32, %c0_i32_0 : i32, i32
  }
  func.func @transform_3(%arg0: i32) -> (i32, i32) {
    %c0_i32 = arith.constant 0 : i32
    %c0_i32_0 = arith.constant 0 : i32
    %c0_i32_1 = arith.constant 0 : i32
    return %c0_i32, %c0_i32_0 : i32, i32
  }
  func.func @transform_4(%arg0: i32) -> (i32, i32) {
    %c0_i32 = arith.constant 0 : i32
    %c0_i32_0 = arith.constant 0 : i32
    %c0_i32_1 = arith.constant 0 : i32
    return %c0_i32, %c0_i32_0 : i32, i32
  }
  func.func @transform_5(%arg0: i32) -> (i32, i32) {
    %c0_i32 = arith.constant 0 : i32
    %c0_i32_0 = arith.constant 0 : i32
    %c0_i32_1 = arith.constant 0 : i32
    return %c0_i32, %c0_i32_0 : i32, i32
  }
  func.func @transform_6(%arg0: i32) -> (i32, i32) {
    %c0_i32 = arith.constant 0 : i32
    %c0_i32_0 = arith.constant 0 : i32
    %c0_i32_1 = arith.constant 0 : i32
    return %c0_i32, %c0_i32_0 : i32, i32
  }
  func.func @transform_7(%arg0: i32) -> (i32, i32) {
    %c0_i32 = arith.constant 0 : i32
    %c0_i32_0 = arith.constant 0 : i32
    %c0_i32_1 = arith.constant 0 : i32
    return %c0_i32, %c0_i32_0 : i32, i32
  }
  func.func @transform_8(%arg0: i32) -> (i32, i32) {
    %c0_i32 = arith.constant 0 : i32
    %c0_i32_0 = arith.constant 0 : i32
    %c0_i32_1 = arith.constant 0 : i32
    return %c0_i32, %c0_i32_0 : i32, i32
  }
  func.func @transform_9(%arg0: i32) -> (i32, i32) {
    %c0_i32 = arith.constant 0 : i32
    %c0_i32_0 = arith.constant 0 : i32
    %c0_i32_1 = arith.constant 0 : i32
    return %c0_i32, %c0_i32_0 : i32, i32
  }
  func.func @transform_10(%arg0: i32) -> (i32, i32) {
    %c0_i32 = arith.constant 0 : i32
    %c0_i32_0 = arith.constant 0 : i32
    %c0_i32_1 = arith.constant 0 : i32
    return %c0_i32, %c0_i32_0 : i32, i32
  }
  func.func @transform_11(%arg0: i32) -> (i32, i32) {
    %c0_i32 = arith.constant 0 : i32
    %c0_i32_0 = arith.constant 0 : i32
    %c0_i32_1 = arith.constant 0 : i32
    return %c0_i32, %c0_i32_0 : i32, i32
  }
  func.func @transform_12(%arg0: i32) -> (i32, i32) {
    %c0_i32 = arith.constant 0 : i32
    %c0_i32_0 = arith.constant 0 : i32
    %c0_i32_1 = arith.constant 0 : i32
    return %c0_i32, %c0_i32_0 : i32, i32
  }
  func.func @transform_13(%arg0: i32) -> (i32, i32) {
    %c0_i32 = arith.constant 0 : i32
    %c0_i32_0 = arith.constant 0 : i32
    %c0_i32_1 = arith.constant 0 : i32
    return %c0_i32, %c0_i32_0 : i32, i32
  }
  func.func @transform_14(%arg0: i32) -> (i32, i32) {
    %c0_i32 = arith.constant 0 : i32
    %c0_i32_0 = arith.constant 0 : i32
    %c0_i32_1 = arith.constant 0 : i32
    return %c0_i32, %c0_i32_0 : i32, i32
  }
  func.func @transform_15(%arg0: i32) -> (i32, i32) {
    %c0_i32 = arith.constant 0 : i32
    %c0_i32_0 = arith.constant 0 : i32
    %c0_i32_1 = arith.constant 0 : i32
    return %c0_i32, %c0_i32_0 : i32, i32
  }
  func.func @transform_16(%arg0: i32) -> (i32, i32) {
    %c0_i32 = arith.constant 0 : i32
    %c0_i32_0 = arith.constant 0 : i32
    %c0_i32_1 = arith.constant 0 : i32
    return %c0_i32, %c0_i32_0 : i32, i32
  }
  func.func @transform_17(%arg0: i32) -> (i32, i32) {
    %c0_i32 = arith.constant 0 : i32
    %c0_i32_0 = arith.constant 0 : i32
    %c0_i32_1 = arith.constant 0 : i32
    return %c0_i32, %c0_i32_0 : i32, i32
  }
  func.func @transform_18(%arg0: i32) -> (i32, i32) {
    %c0_i32 = arith.constant 0 : i32
    %c0_i32_0 = arith.constant 0 : i32
    return %arg0, %c0_i32 : i32, i32
  }
}

</mosaic_0001>

<bundles_post_ra>
// kernel: tpu_custom_call.1
= control target key start
LH: loop header
LB: loop body
LE: loop exit
PB: predicated region body
PF: predicated region fallthrough
CT: control target
= control target key end

     0   :  { %s3747_s0 = inlined_call_operand.vmem [shape: bf16[128,32], index: 0, kind: input, shape index: {}]   ;;  %s3748_s1 = inlined_call_operand.vmem [shape: bf16[16,32], index: 1, kind: input, shape index: {}]   ;;  %s3749_s2 = inlined_call_operand.vmem [shape: bf16[32,32], index: 2, kind: input, shape index: {}]   ;;  %s3750_s3 = inlined_call_operand.vmem [shape: f32[1,32], index: 3, kind: input, shape index: {}]   ;;  %s3751_s4 = inlined_call_operand.vmem [shape: bf16[32,64], index: 4, kind: input, shape index: {}]   ;;  %s3752_s5 = inlined_call_operand.vmem [shape: f32[1,64], index: 5, kind: input, shape index: {}]   ;;  %s3753_s6 = inlined_call_operand.vmem [shape: bf16[64,72], index: 6, kind: input, shape index: {}]   ;;  %s3754_s7 = inlined_call_operand.vmem [shape: f32[1,72], index: 7, kind: input, shape index: {}]   ;;  %s3755_s8 = inlined_call_operand.vmem [shape: bf16[72,64], index: 8, kind: input, shape index: {}]   ;;  %s3756_s9 = inlined_call_operand.vmem [shape: f32[1,64], index: 9, kind: input, shape index: {}]   ;;  %s3757_s10 = inlined_call_operand.vmem [shape: bf16[64,144], index: 10, kind: input, shape index: {}]   ;;  %s3758_s11 = inlined_call_operand.vmem [shape: f32[1,144], index: 11, kind: input, shape index: {}]   ;;  %s3759_s12 = inlined_call_operand.vmem [shape: bf16[144,128], index: 12, kind: input, shape index: {}]   ;;  %s3760_s13 = inlined_call_operand.vmem [shape: f32[1,128], index: 13, kind: input, shape index: {}]   ;;  %s3761_s14 = inlined_call_operand.vmem [shape: bf16[128,72], index: 14, kind: input, shape index: {}]   ;;  %s3762_s15 = inlined_call_operand.vmem [shape: f32[1,72], index: 15, kind: input, shape index: {}]   ;;  %s3763_s16 = inlined_call_operand.vmem [shape: bf16[72,64], index: 16, kind: input, shape index: {}]   ;;  %s3764_s17 = inlined_call_operand.vmem [shape: f32[1,64], index: 17, kind: input, shape index: {}]   ;;  %s3765_s18 = inlined_call_operand.hbm [shape: f32[16,128], index: 18, kind: output, shape index: {}]  }
   0x1   :  { %3777 = sst [smem:[#allocation5_spill]] %s3747_s0 }
   0x2   :  { %3778 = sst [smem:[#allocation6_spill]] %s3748_s1 }
   0x3   :  { %3779 = sst [smem:[#allocation7_spill]] %s3749_s2 }
   0x4   :  { %s3780_s29 = sld [smem:[#allocation7_spill]] }
   0xa   :  { %v2685_v0 = vld [vmem:[%s3780_s29 + $0x8] sm:$0xff]  ;;  %v2684_v1 = vld [vmem:[%s3780_s29] sm:$0xff] }
   0xb   :  { %175 = vmatpush.bf16.msra.mxu0 %v2685_v0 }
   0xc   :  { %23 = vsyncpa [#allocation3], 0  ;;  %s3781_s20 = sld [smem:[#allocation5_spill]]  ;;  %vm141_vm0 = vcmask 261120   ;;  %v2687_v9 = vld [vmem:[%s3751_s4 + $0x8] sm:$0xff]  ;;  %v2686_v10 = vld [vmem:[%s3751_s4] sm:$0xff] }
   0xd   :  { %396 = vmatpush.bf16.msra.mxu1 %v2687_v9  ;;  %v128_v12 = vld [vmem:[%s3750_s3] sm:$0x1]  ;;  %s3782_s28 = sld [smem:[#allocation6_spill]]  ;;  %vm614_vm1 = vcmask 523264   ;;  %vm692_vm2 = vcmask 1043456   ;;  %vm688_vm3 = vcmask 588800  }
   0xe   :  { %v241_v13 = vpack.c.bf16 %v128_v12, %v128_v12  ;;  %vm1211_vm4 = vcmask 130048   ;;  %vm2370_vm5 = vcmask 1041409   ;;  %vm2372_vm6 = vcmask 1042434   ;;  %s2403_s27 = sshll.u32 %s3765_s18, 4  ;;  %s2823_s3 = smov 8   ;;  %s2404_s27 = int_to_ptr.hbm [resolvable:$true] %s2403_s27 }
   0xf   :  { %176 = vmatpush.bf16.msra.mxu0 %v2684_v1  ;;  %vm2374_vm7 = vcmask 1043459   ;;  %vm2376_vm8 = vcmask 1044484   ;;  %vm2378_vm9 = vcmask 1045509   ;;  %vm2380_vm10 = vcmask 1046534  }
  0x10   :  { %v243_v14 = vpack.i.b16 %v241_v13, %v241_v13  ;;  %vm2382_vm11 = vcmask 1047559  }
  0x11   :  { %397 = vmatpush.bf16.msra.mxu1 %v2686_v10 }
  0x12   :  { %v2675_v2 = vld [vmem:[%s3781_s20] sm:$0xff]  ;;  %v2676_v3 = vld [vmem:[%s3781_s20 + $0x8] sm:$0xff]  ;;  %v2677_v4 = vld [vmem:[%s3781_s20 + $0x10] sm:$0xff]  ;;  %v245_v18 = vperm.slane %v243_v14, 0 }
  0x13   :  { %2459 = vmatmul.msk.bf16.vlgmr.msra.gmra.mxu0 %vm141_vm0, %v2675_v2  ;;  %v2678_v5 = vld [vmem:[%s3781_s20 + $0x18] sm:$0xff]  ;;  %v2679_v6 = vld [vmem:[%s3781_s20 + $0x20] sm:$0xff]  ;;  %v2680_v7 = vld [vmem:[%s3781_s20 + $0x28] sm:$0xff] }
  0x14   :  { %v2681_v8 = vld [vmem:[%s3781_s20 + $0x30] sm:$0xff]  ;;  %v2682_v11 = vld [vmem:[%s3781_s20 + $0x38] sm:$0xff]  ;;  %v2683_v15 = vld [vmem:[%s3782_s28] sm:$0xff]  ;;  %v2970_v20 = vunpack.c.l.bf16 %v245_v18  ;;  %s2822_s28 = smov 128  }
  0x23   :  { %2460 = vmatmul.msk.bf16.gmra.mxu0 %vm141_vm0, %v2676_v3 }
  0x33   :  { %2461 = vmatmul.msk.bf16.gmra.mxu0 %vm141_vm0, %v2677_v4 }
  0x43   :  { %2462 = vmatmul.msk.bf16.gmra.mxu0 %vm141_vm0, %v2678_v5 }
  0x53   :  { %2463 = vmatmul.msk.bf16.gmra.mxu0 %vm141_vm0, %v2679_v6 }
  0x63   :  { %2464 = vmatmul.msk.bf16.gmra.mxu0 %vm141_vm0, %v2680_v7 }
  0x73   :  { %2465 = vmatmul.msk.bf16.gmra.mxu0 %vm141_vm0, %v2681_v8 }
  0x83   :  { %2466 = vmatmul.msk.bf16.gmra.mxu0 %vm141_vm0, %v2682_v11 }
  0x90   :  { %v178_v16 = vpop.f32.mrf.mxu0 }
  0x91   :  { %v223_v17 = vpack.c.bf16 %v178_v16, %v178_v16 }
  0x93   :  { %2467 = vmatmul.msk.bf16.gmra.mxu0 %vm141_vm0, %v2683_v15  ;;  %v246_v19 = vunpack.c.l.bf16 %v223_v17 }
  0x95   :  { %v265_v23 = vadd.f32 %v2970_v20, %v246_v19 }
  0x97   :  { %v319_v26 = vmax.f32 %v265_v23, 0.0 }
  0x98   :  { %v180_v21 = vpop.f32.mrf.mxu0 }
  0x99   :  { %v224_v22 = vpack.c.bf16 %v180_v21, %v180_v21 }
  0x9b   :  { %v247_v24 = vunpack.c.l.bf16 %v224_v22 }
  0x9d   :  { %v266_v25 = vadd.f32 %v2970_v20, %v247_v24 }
  0x9f   :  { %v320_v27 = vmax.f32 %v266_v25, 0.0 }
  0xa0   :  { %v183_v28 = vpop.f32.mrf.mxu0 }
  0xa1   :  { %v337_v29 = vpack.c.bf16 %v320_v27, %v319_v26  ;;  %v225_v30 = vpack.c.bf16 %v183_v28, %v183_v28 }
  0xa3   :  { %2476 = vmatmul.msk.bf16.vlgmr.msra.gmra.mxu1 %vm141_vm0, %v337_v29  ;;  %v248_v31 = vunpack.c.l.bf16 %v225_v30 }
  0xa5   :  { %v267_v34 = vadd.f32 %v2970_v20, %v248_v31 }
  0xa7   :  { %v321_v37 = vmax.f32 %v267_v34, 0.0 }
  0xa8   :  { %v185_v32 = vpop.f32.mrf.mxu0 }
  0xa9   :  { %v226_v33 = vpack.c.bf16 %v185_v32, %v185_v32 }
  0xab   :  { %v249_v35 = vunpack.c.l.bf16 %v226_v33 }
  0xad   :  { %v268_v36 = vadd.f32 %v2970_v20, %v249_v35 }
  0xaf   :  { %v322_v38 = vmax.f32 %v268_v36, 0.0 }
  0xb0   :  { %v188_v39 = vpop.f32.mrf.mxu0 }
  0xb1   :  { %v338_v40 = vpack.c.bf16 %v322_v38, %v321_v37  ;;  %v227_v41 = vpack.c.bf16 %v188_v39, %v188_v39 }
  0xb3   :  { %2477 = vmatmul.msk.bf16.gmra.mxu1 %vm141_vm0, %v338_v40  ;;  %v250_v42 = vunpack.c.l.bf16 %v227_v41 }
  0xb5   :  { %v269_v45 = vadd.f32 %v2970_v20, %v250_v42 }
  0xb7   :  { %v323_v48 = vmax.f32 %v269_v45, 0.0 }
  0xb8   :  { %v190_v43 = vpop.f32.mrf.mxu0 }
  0xb9   :  { %v228_v44 = vpack.c.bf16 %v190_v43, %v190_v43 }
  0xbb   :  { %v251_v46 = vunpack.c.l.bf16 %v228_v44 }
  0xbd   :  { %v270_v47 = vadd.f32 %v2970_v20, %v251_v46 }
  0xbf   :  { %v324_v49 = vmax.f32 %v270_v47, 0.0 }
  0xc0   :  { %v193_v50 = vpop.f32.mrf.mxu0 }
  0xc1   :  { %v339_v51 = vpack.c.bf16 %v324_v49, %v323_v48  ;;  %v229_v52 = vpack.c.bf16 %v193_v50, %v193_v50 }
  0xc3   :  { %2478 = vmatmul.msk.bf16.gmra.mxu1 %vm141_vm0, %v339_v51  ;;  %v252_v53 = vunpack.c.l.bf16 %v229_v52 }
  0xc5   :  { %v271_v56 = vadd.f32 %v2970_v20, %v252_v53 }
  0xc7   :  { %v325_v59 = vmax.f32 %v271_v56, 0.0 }
  0xc8   :  { %v195_v54 = vpop.f32.mrf.mxu0 }
  0xc9   :  { %v230_v55 = vpack.c.bf16 %v195_v54, %v195_v54 }
  0xcb   :  { %v253_v57 = vunpack.c.l.bf16 %v230_v55 }
  0xcd   :  { %v272_v58 = vadd.f32 %v2970_v20, %v253_v57 }
  0xcf   :  { %v326_v60 = vmax.f32 %v272_v58, 0.0 }
  0xd0   :  { %v198_v61 = vpop.f32.mrf.mxu0 }
  0xd1   :  { %v340_v62 = vpack.c.bf16 %v326_v60, %v325_v59  ;;  %v231_v63 = vpack.c.bf16 %v198_v61, %v198_v61 }
  0xd3   :  { %2479 = vmatmul.msk.bf16.gmra.mxu1 %vm141_vm0, %v340_v62  ;;  %v254_v0 = vunpack.c.l.bf16 %v231_v63  ;;  %v350_v62 = vld [vmem:[%s3752_s5] sm:$0x1] }
  0xd5   :  { %v273_v3 = vadd.f32 %v2970_v20, %v254_v0  ;;  %v462_v0 = vpack.c.bf16 %v350_v62, %v350_v62 }
  0xd7   :  { %v327_v6 = vmax.f32 %v273_v3, 0.0 }
  0xd8   :  { %v200_v1 = vpop.f32.mrf.mxu0 }
  0xd9   :  { %v232_v2 = vpack.c.bf16 %v200_v1, %v200_v1  ;;  %v464_v1 = vpack.i.b16 %v462_v0, %v462_v0 }
  0xdb   :  { %v255_v4 = vunpack.c.l.bf16 %v232_v2  ;;  %v466_v3 = vperm.slane %v464_v1, 0 }
  0xdd   :  { %v274_v5 = vadd.f32 %v2970_v20, %v255_v4 }
  0xdf   :  { %v328_v7 = vmax.f32 %v274_v5, 0.0 }
  0xe0   :  { %v203_v8 = vpop.f32.mrf.mxu0 }
  0xe1   :  { %v341_v9 = vpack.c.bf16 %v328_v7, %v327_v6  ;;  %v233_v10 = vpack.c.bf16 %v203_v8, %v203_v8  ;;  %v3022_v6 = vunpack.c.l.bf16 %v466_v3  ;;  %v2697_v3 = vld [vmem:[%s3757_s10 + $0x4] sm:$0xf0] }
  0xe3   :  { %2480 = vmatmul.msk.bf16.gmra.mxu1 %vm141_vm0, %v341_v9  ;;  %v256_v11 = vunpack.c.l.bf16 %v233_v10 }
  0xe5   :  { %v275_v14 = vadd.f32 %v2970_v20, %v256_v11 }
  0xe7   :  { %v329_v17 = vmax.f32 %v275_v14, 0.0 }
  0xe8   :  { %v205_v12 = vpop.f32.mrf.mxu0 }
  0xe9   :  { %v234_v13 = vpack.c.bf16 %v205_v12, %v205_v12 }
  0xeb   :  { %v257_v15 = vunpack.c.l.bf16 %v234_v13 }
  0xed   :  { %v276_v16 = vadd.f32 %v2970_v20, %v257_v15 }
  0xef   :  { %v330_v18 = vmax.f32 %v276_v16, 0.0 }
  0xf0   :  { %v208_v19 = vpop.f32.mrf.mxu0 }
  0xf1   :  { %v342_v21 = vpack.c.bf16 %v330_v18, %v329_v17  ;;  %v235_v22 = vpack.c.bf16 %v208_v19, %v208_v19 }
  0xf3   :  { %2481 = vmatmul.msk.bf16.gmra.mxu1 %vm141_vm0, %v342_v21  ;;  %v258_v23 = vunpack.c.l.bf16 %v235_v22 }
  0xf5   :  { %v277_v26 = vadd.f32 %v2970_v20, %v258_v23  ;;  %v2691_v23 = vld [vmem:[%s3753_s6 + $0x18] sm:$0xff] }
  0xf6   :  { %622 = vmatpush.bf16.msra.mxu2 %v2691_v23 }
  0xf7   :  { %v331_v29 = vmax.f32 %v277_v26, 0.0 }
  0xf8   :  { %v210_v24 = vpop.f32.mrf.mxu0 }
  0xf9   :  { %v236_v25 = vpack.c.bf16 %v210_v24, %v210_v24 }
  0xfb   :  { %v259_v27 = vunpack.c.l.bf16 %v236_v25 }
  0xfd   :  { %v278_v28 = vadd.f32 %v2970_v20, %v259_v27  ;;  %v2690_v27 = vld [vmem:[%s3753_s6 + $0x10] sm:$0xff] }
  0xfe   :  { %623 = vmatpush.bf16.msra.mxu2 %v2690_v27 }
  0xff   :  { %v332_v30 = vmax.f32 %v278_v28, 0.0 }
 0x100   :  { %v213_v31 = vpop.f32.mrf.mxu0 }
 0x101   :  { %v343_v32 = vpack.c.bf16 %v332_v30, %v331_v29  ;;  %v237_v33 = vpack.c.bf16 %v213_v31, %v213_v31  ;;  %v2689_v31 = vld [vmem:[%s3753_s6 + $0x8] sm:$0xff] }
 0x102   :  { %624 = vmatpush.bf16.msra.mxu2 %v2689_v31 }
 0x103   :  { %2482 = vmatmul.msk.bf16.gmra.mxu1 %vm141_vm0, %v343_v32  ;;  %v260_v34 = vunpack.c.l.bf16 %v237_v33 }
 0x105   :  { %v279_v37 = vadd.f32 %v2970_v20, %v260_v34 }
 0x107   :  { %v333_v40 = vmax.f32 %v279_v37, 0.0  ;;  %v2688_v37 = vld [vmem:[%s3753_s6] sm:$0xff] }
 0x108   :  { %v215_v35 = vpop.f32.mrf.mxu0  ;;  %625 = vmatpush.bf16.msra.mxu2 %v2688_v37 }
 0x109   :  { %v238_v36 = vpack.c.bf16 %v215_v35, %v215_v35 }
 0x10b   :  { %v261_v38 = vunpack.c.l.bf16 %v238_v36 }
 0x10d   :  { %v280_v39 = vadd.f32 %v2970_v20, %v261_v38 }
 0x10f   :  { %v334_v41 = vmax.f32 %v280_v39, 0.0 }
 0x110   :  { %v218_v42 = vpop.f32.mrf.mxu0 }
 0x111   :  { %v344_v43 = vpack.c.bf16 %v334_v41, %v333_v40  ;;  %v239_v44 = vpack.c.bf16 %v218_v42, %v218_v42  ;;  %v2545_v41 = vld [vmem:[%s3757_s10 + $0x30] sm:$0xf]  ;;  %v2703_v42 = vld [vmem:[%s3757_s10 + $0x34] sm:$0xf0] }
 0x113   :  { %2483 = vmatmul.msk.bf16.gmra.mxu1 %vm141_vm0, %v344_v43  ;;  %v262_v45 = vunpack.c.l.bf16 %v239_v44  ;;  %v2546_v44 = vor.u32 %v2703_v42, %v2545_v41 }
 0x115   :  { %v281_v48 = vadd.f32 %v2970_v20, %v262_v45  ;;  %847 = vmatpush.bf16.msrb.mxu2 %v2546_v44 }
 0x117   :  { %v335_v51 = vmax.f32 %v281_v48, 0.0 }
 0x118   :  { %v220_v46 = vpop.f32.mrf.mxu0 }
 0x119   :  { %v240_v47 = vpack.c.bf16 %v220_v46, %v220_v46  ;;  %v2537_v46 = vld [vmem:[%s3757_s10 + $0x20] sm:$0xf] }
 0x11b   :  { %v263_v49 = vunpack.c.l.bf16 %v240_v47  ;;  %v2701_v47 = vld [vmem:[%s3757_s10 + $0x24] sm:$0xf0] }
 0x11d   :  { %v282_v50 = vadd.f32 %v2970_v20, %v263_v49  ;;  %v2538_v49 = vor.u32 %v2701_v47, %v2537_v46 }
 0x11f   :  { %v336_v52 = vmax.f32 %v282_v50, 0.0  ;;  %848 = vmatpush.bf16.msrb.mxu2 %v2538_v49 }
 0x120   :  { %v2998_v53 = vpop.f32.mrf.mxu1 }
 0x121   :  { %v345_v54 = vpack.c.bf16 %v336_v52, %v335_v51  ;;  %v2529_v51 = vld [vmem:[%s3757_s10 + $0x10] sm:$0xf]  ;;  %v2699_v52 = vld [vmem:[%s3757_s10 + $0x14] sm:$0xf0] }
 0x122   :  { %v2530_v0 = vor.u32 %v2699_v52, %v2529_v51 }
 0x123   :  { %2484 = vmatmul.msk.bf16.gmra.mxu1 %vm141_vm0, %v345_v54 }
 0x124   :  { %849 = vmatpush.bf16.msrb.mxu2 %v2530_v0 }
 0x128   :  { %v3001_v55 = vpop.f32.mrf.mxu1 }
 0x130   :  { %v3003_v56 = vpop.f32.mrf.mxu1 }
 0x138   :  { %v3005_v57 = vpop.f32.mrf.mxu1 }
 0x140   :  { %v3007_v58 = vpop.f32.mrf.mxu1 }
 0x148   :  { %v3009_v59 = vpop.f32.mrf.mxu1 }
 0x149   :  { %v449_v49 = vpack.c.bf16 %v3009_v59, %v3009_v59 }
 0x14b   :  { %v472_v52 = vunpack.c.l.bf16 %v449_v49 }
 0x14d   :  { %v491_v0 = vadd.f32 %v3022_v6, %v472_v52 }
 0x150   :  { %v3011_v60 = vpop.f32.mrf.mxu1 }
 0x158   :  { %v3013_v20 = vpop.f32.mrf.mxu1 }
 0x160   :  { %v3015_v61 = vpop.f32.mrf.mxu1 }
 0x168   :  { %v3020_v63 = vpop.f32.mrf.mxu1 }
 0x170   :  { %v424_v2 = vpop.f32.mrf.mxu1 }
 0x171   :  { %v454_v4 = vpack.c.bf16 %v424_v2, %v424_v2  ;;  %v2521_v2 = vld [vmem:[%s3757_s10] sm:$0xf] }
 0x173   :  { %v477_v5 = vunpack.c.l.bf16 %v454_v4 }
 0x175   :  { %v496_v7 = vadd.f32 %v3022_v6, %v477_v5 }
 0x177   :  { %v550_v10 = vmax.f32 %v496_v7, 0.0 }
 0x178   :  { %v426_v8 = vpop.f32.mrf.mxu1 }
 0x179   :  { %v455_v9 = vpack.c.bf16 %v426_v8, %v426_v8  ;;  %v568_v13 = vpack.c.bf16 %v550_v10, %v550_v10  ;;  %v2522_v8 = vor.u32 %v2697_v3, %v2521_v2  ;;  %v545_v3 = vmax.f32 %v491_v0, 0.0 }
 0x17b   :  { %v478_v11 = vunpack.c.l.bf16 %v455_v9  ;;  %v765_v18 = vunpack.c.l.b16 %v568_v13  ;;  %850 = vmatpush.bf16.msrb.mxu2 %v2522_v8  ;;  %v563_v59 = vpack.c.bf16 %v545_v3, %v545_v3  ;;  %v1926_v3 = vld [vmem:[%s3763_s16 + $0x20] sm:$0xf] }
 0x17d   :  { %v497_v12 = vadd.f32 %v3022_v6, %v478_v11  ;;  %v760_v8 = vunpack.c.l.b16 %v563_v59 }
 0x17f   :  { %v551_v14 = vmax.f32 %v497_v12, 0.0 }
 0x180   :  { %v429_v15 = vpop.f32.mrf.mxu1 }
 0x181   :  { %v569_v16 = vpack.c.bf16 %v551_v14, %v551_v14  ;;  %v456_v17 = vpack.c.bf16 %v429_v15, %v429_v15 }
 0x183   :  { %v766_v19 = vunpack.c.l.b16 %v569_v16  ;;  %v479_v21 = vunpack.c.l.bf16 %v456_v17 }
 0x185   :  { %v3026_v22 = vpack.c.b16 %v766_v19, %v765_v18  ;;  %v498_v24 = vadd.f32 %v3022_v6, %v479_v21  ;;  %v445_v21 = vpack.c.bf16 %v3001_v55, %v3001_v55 }
 0x187   :  { %v552_v28 = vmax.f32 %v498_v24, 0.0  ;;  %v444_v24 = vpack.c.bf16 %v2998_v53, %v2998_v53  ;;  %v468_v27 = vunpack.c.l.bf16 %v445_v21  ;;  %v447_v53 = vpack.c.bf16 %v3005_v57, %v3005_v57 }
 0x188   :  { %v431_v25 = vpop.f32.mrf.mxu1 }
 0x189   :  { %v457_v26 = vpack.c.bf16 %v431_v25, %v431_v25  ;;  %v570_v32 = vpack.c.bf16 %v552_v28, %v552_v28 }
 0x18b   :  { %v480_v29 = vunpack.c.l.bf16 %v457_v26  ;;  %v767_v38 = vunpack.c.l.b16 %v570_v32  ;;  %v487_v32 = vadd.f32 %v3022_v6, %v468_v27 }
 0x18d   :  { %v499_v30 = vadd.f32 %v3022_v6, %v480_v29  ;;  %v467_v29 = vunpack.c.l.bf16 %v444_v24  ;;  %v541_v55 = vmax.f32 %v487_v32, 0.0 }
 0x18f   :  { %v553_v33 = vmax.f32 %v499_v30, 0.0 }
 0x190   :  { %v434_v34 = vpop.f32.mrf.mxu1 }
 0x191   :  { %v571_v35 = vpack.c.bf16 %v553_v33, %v553_v33  ;;  %v458_v36 = vpack.c.bf16 %v434_v34, %v434_v34  ;;  %v486_v34 = vadd.f32 %v3022_v6, %v467_v29 }
 0x193   :  { %v768_v39 = vunpack.c.l.b16 %v571_v35  ;;  %v481_v40 = vunpack.c.l.bf16 %v458_v36  ;;  %v540_v35 = vmax.f32 %v486_v34, 0.0  ;;  %v559_v36 = vpack.c.bf16 %v541_v55, %v541_v55  ;;  %v659_v34 = vld [vmem:[%s3755_s8 + $0x20] sm:$0xf] }
 0x194   :  { %v678_v55 = vunpack.c.l.b16 %v659_v34 }
 0x195   :  { %v3048_v43 = vpack.c.b16 %v768_v39, %v767_v38  ;;  %v500_v45 = vadd.f32 %v3022_v6, %v481_v40  ;;  %v558_v37 = vpack.c.bf16 %v540_v35, %v540_v35  ;;  %v446_v38 = vpack.c.bf16 %v3003_v56, %v3003_v56 }
 0x196   :  { %v756_v39 = vunpack.c.l.b16 %v559_v36  ;;  %v470_v40 = vunpack.c.l.bf16 %v447_v53  ;;  %v2695_v36 = vld [vmem:[%s3755_s8 + $0x18] sm:$0xff]  ;;  %v2694_v53 = vld [vmem:[%s3755_s8 + $0x10] sm:$0xff] }
 0x197   :  { %v554_v54 = vmax.f32 %v500_v45, 0.0  ;;  %v755_v41 = vunpack.c.l.b16 %v558_v37  ;;  %v469_v42 = vunpack.c.l.bf16 %v446_v38  ;;  %v2693_v37 = vld [vmem:[%s3755_s8 + $0x8] sm:$0xff]  ;;  %v2692_v38 = vld [vmem:[%s3755_s8] sm:$0xff] }
 0x198   :  { %v436_v48 = vpop.f32.mrf.mxu1  ;;  %v489_v44 = vadd.f32 %v3022_v6, %v470_v40  ;;  %v2547_v40 = vld [vmem:[%s3757_s10 + $0x38] sm:$0xf0] }
 0x199   :  { %v459_v50 = vpack.c.bf16 %v436_v48, %v436_v48  ;;  %v572_v4 = vpack.c.bf16 %v554_v54, %v554_v54  ;;  %v3086_v45 = vpack.c.b16 %v756_v39, %v755_v41  ;;  %v488_v46 = vadd.f32 %v3022_v6, %v469_v42  ;;  %v2702_v39 = vld [vmem:[%s3757_s10 + $0x34] sm:$0xf]  ;;  %v2700_v42 = vld [vmem:[%s3757_s10 + $0x24] sm:$0xf] }
 0x19a   :  { %v543_v47 = vmax.f32 %v489_v44, 0.0  ;;  %v2550_v41 = vor.u32 %v2702_v39, %v2547_v40  ;;  %v2539_v44 = vld [vmem:[%s3757_s10 + $0x28] sm:$0xf0] }
 0x19b   :  { %v482_v62 = vunpack.c.l.bf16 %v459_v50  ;;  %v769_v11 = vunpack.c.l.b16 %v572_v4  ;;  %v542_v48 = vmax.f32 %v488_v46, 0.0  ;;  %v448_v50 = vpack.c.bf16 %v3007_v58, %v3007_v58 }
 0x19c   :  { %v561_v57 = vpack.c.bf16 %v543_v47, %v543_v47  ;;  %v2542_v46 = vor.u32 %v2700_v42, %v2539_v44  ;;  %v584_v47 = vld [vmem:[%s3754_s7] sm:$0x1] }
 0x19d   :  { %v501_v1 = vadd.f32 %v3022_v6, %v482_v62  ;;  %v560_v56 = vpack.c.bf16 %v542_v48, %v542_v48  ;;  %v471_v62 = vunpack.c.l.bf16 %v448_v50  ;;  %v2698_v48 = vld [vmem:[%s3757_s10 + $0x14] sm:$0xf]  ;;  %v2523_v50 = vld [vmem:[%s3757_s10 + $0x8] sm:$0xf0] }
 0x19e   :  { %v758_v51 = vunpack.c.l.b16 %v561_v57  ;;  %v2531_v57 = vld [vmem:[%s3757_s10 + $0x18] sm:$0xf0] }
 0x19f   :  { %v555_v5 = vmax.f32 %v501_v1, 0.0  ;;  %v757_v54 = vunpack.c.l.b16 %v560_v56  ;;  %v490_v2 = vadd.f32 %v3022_v6, %v471_v62  ;;  %v2534_v49 = vor.u32 %v2698_v48, %v2531_v57  ;;  %v2696_v56 = vld [vmem:[%s3757_s10 + $0x4] sm:$0xf] }
 0x1a0   :  { %v439_v7 = vpop.f32.mrf.mxu1  ;;  %v2526_v52 = vor.u32 %v2696_v56, %v2523_v50 }
 0x1a1   :  { %v573_v9 = vpack.c.bf16 %v555_v5, %v555_v5  ;;  %v460_v10 = vpack.c.bf16 %v439_v7, %v439_v7  ;;  %v3096_v1 = vpack.c.b16 %v758_v51, %v757_v54  ;;  %v544_v4 = vmax.f32 %v490_v2, 0.0 }
 0x1a2   :  { %v451_v5 = vpack.c.bf16 %v3013_v20, %v3013_v20  ;;  %v450_v7 = vpack.c.bf16 %v3011_v60, %v3011_v60  ;;  %v634_v51 = vpack.c.bf16 %v584_v47, %v584_v47 }
 0x1a3   :  { %v770_v12 = vunpack.c.l.b16 %v573_v9  ;;  %v483_v13 = vunpack.c.l.bf16 %v460_v10  ;;  %v562_v58 = vpack.c.bf16 %v544_v4, %v544_v4 }
 0x1a4   :  { %v474_v9 = vunpack.c.l.bf16 %v451_v5  ;;  %v636_v54 = vpack.i.b16 %v634_v51, %v634_v51 }
 0x1a5   :  { %v3070_v14 = vpack.c.b16 %v770_v12, %v769_v11  ;;  %v502_v15 = vadd.f32 %v3022_v6, %v483_v13  ;;  %v759_v10 = vunpack.c.l.b16 %v562_v58  ;;  %v473_v11 = vunpack.c.l.bf16 %v450_v7  ;;  %v2711_v58 = vld [vmem:[%s3759_s12 + $0x38] sm:$0xff]  ;;  %v2712_v7 = vld [vmem:[%s3759_s12 + $0x40] sm:$0xff] }
 0x1a6   :  { %v493_v12 = vadd.f32 %v3022_v6, %v474_v9  ;;  %v638_v2 = vperm.slane %v636_v54, 0  ;;  %1236 = vmatpush.bf16.msrb.mxu0 %v2711_v58  ;;  %1292 = vmatpush.bf16.msrb.mxu1 %v2712_v7 }
 0x1a7   :  { %v556_v18 = vmax.f32 %v502_v15, 0.0  ;;  %v3106_v13 = vpack.c.b16 %v760_v8, %v759_v10  ;;  %v492_v15 = vadd.f32 %v3022_v6, %v473_v11  ;;  %v1948_v8 = vunpack.c.l.b16 %v1926_v3 }
 0x1a8   :  { %v441_v16 = vpop.f32.mrf.mxu1  ;;  %v641_v59 = vunpack.c.l.bf16 %v638_v2 }
 0x1a9   :  { %v461_v17 = vpack.c.bf16 %v441_v16, %v441_v16  ;;  %v574_v25 = vpack.c.bf16 %v556_v18, %v556_v18  ;;  %v547_v16 = vmax.f32 %v493_v12, 0.0  ;;  %v453_v18 = vpack.c.bf16 %v3020_v63, %v3020_v63 }
 0x1aa   :  { %v1953_v12 = vpack.c.b16 %v1948_v8, %v1948_v8 }
 0x1ab   :  { %v484_v19 = vunpack.c.l.bf16 %v461_v17  ;;  %v587_v30 = vunpack.c.l.b16 %v574_v25  ;;  %v546_v17 = vmax.f32 %v492_v15, 0.0  ;;  %v565_v20 = vpack.c.bf16 %v547_v16, %v547_v16 }
 0x1ad   :  { %v503_v23 = vadd.f32 %v3022_v6, %v484_v19  ;;  %v564_v60 = vpack.c.bf16 %v546_v17, %v546_v17  ;;  %v452_v19 = vpack.c.bf16 %v3015_v61, %v3015_v61  ;;  %v762_v21 = vunpack.c.l.b16 %v565_v20 }
 0x1ae   :  { %v1983_v20 = vsel %vm692_vm2, %v1953_v12, 0  ;;  %v2720_v12 = vld [vmem:[%s3761_s14 + $0x38] sm:$0xff] }
 0x1af   :  { %v557_v26 = vmax.f32 %v503_v23, 0.0  ;;  %v476_v23 = vunpack.c.l.bf16 %v453_v18  ;;  %v761_v24 = vunpack.c.l.b16 %v564_v60  ;;  %v475_v25 = vunpack.c.l.bf16 %v452_v19  ;;  %v2710_v60 = vld [vmem:[%s3759_s12 + $0x30] sm:$0xff]  ;;  %v2709_v19 = vld [vmem:[%s3759_s12 + $0x28] sm:$0xff] }
 0x1b0   :  { %1237 = vmatpush.bf16.msrb.mxu0 %v2710_v60 }
 0x1b1   :  { %v575_v28 = vpack.c.bf16 %v557_v26, %v557_v26  ;;  %v495_v26 = vadd.f32 %v3022_v6, %v476_v23  ;;  %v3116_v27 = vpack.c.b16 %v762_v21, %v761_v24  ;;  %v2708_v21 = vld [vmem:[%s3759_s12 + $0x20] sm:$0xff] }
 0x1b2   :  { %v660_v24 = vld [vmem:[%s3756_s9] sm:$0x1]  ;;  %s2820_s9 = smov 64  }
 0x1b3   :  { %v588_v31 = vunpack.c.l.b16 %v575_v28  ;;  %v494_v28 = vadd.f32 %v3022_v6, %v475_v25  ;;  %v549_v29 = vmax.f32 %v495_v26, 0.0  ;;  %v683_v6 = vpack.c.b16 %v678_v55, %v678_v55  ;;  %v2704_v26 = vld [vmem:[%s3759_s12] sm:$0xff] }
 0x1b4   :  { %1238 = vmatpush.bf16.msrb.mxu0 %v2709_v19  ;;  %v712_v25 = vpack.c.bf16 %v660_v24, %v660_v24 }
 0x1b5   :  { %v589_v33 = vpack.c.b16 %v588_v31, %v587_v30  ;;  %v548_v30 = vmax.f32 %v494_v28, 0.0  ;;  %v567_v63 = vpack.c.bf16 %v549_v29, %v549_v29  ;;  %v694_v35 = vsel %vm692_vm2, %v683_v6, 0 }
 0x1b6   :  { %699 = vmatpush.bf16.msra.mxu3 %v694_v35 }
 0x1b7   :  { %2501 = vmatmul.msk.bf16.vlgmr.msra.gmra.mxu2 %vm614_vm1, %v589_v33  ;;  %v566_v31 = vpack.c.bf16 %v548_v30, %v548_v30  ;;  %v764_v32 = vunpack.c.l.b16 %v567_v63 }
 0x1b8   :  { %1239 = vmatpush.bf16.msrb.mxu0 %v2708_v21  ;;  %1759 = vmatpush.bf16.msra.mxu2 %v2720_v12 }
 0x1b9   :  { %v763_v33 = vunpack.c.l.b16 %v566_v31 }
 0x1ba   :  { %700 = vmatpush.bf16.msra.mxu3 %v2695_v36 }
 0x1bb   :  { %v3121_v61 = vpack.c.b16 %v764_v32, %v763_v33 }
 0x1be   :  { %701 = vmatpush.bf16.msra.mxu3 %v2694_v53 }
 0x1c2   :  { %702 = vmatpush.bf16.msra.mxu3 %v2693_v37 }
 0x1c6   :  { %703 = vmatpush.bf16.msra.mxu3 %v2692_v38 }
 0x1c7   :  { %2551 = vmatmul.msk.bf16.vlgmr.msrb.gmra.mxu2 %vm614_vm1, %v3086_v45 }
 0x1ca   :  { %896 = vmatpush.bf16.msrb.mxu3 %v2550_v41 }
 0x1ce   :  { %897 = vmatpush.bf16.msrb.mxu3 %v2542_v46 }
 0x1d2   :  { %898 = vmatpush.bf16.msrb.mxu3 %v2534_v49 }
 0x1d6   :  { %899 = vmatpush.bf16.msrb.mxu3 %v2526_v52 }
 0x1d7   :  { %2552 = vmatmul.msk.bf16.gmra.mxu2 %vm614_vm1, %v3096_v1 }
 0x1e7   :  { %2553 = vmatmul.msk.bf16.gmra.mxu2 %vm614_vm1, %v3106_v13 }
 0x1f7   :  { %2554 = vmatmul.msk.bf16.gmra.mxu2 %vm614_vm1, %v3116_v27 }
 0x207   :  { %2555 = vmatmul.msk.bf16.gmra.mxu2 %vm614_vm1, %v3121_v61 }
 0x217   :  { %2556 = vmatmul.msk.bf16.gmra.mxu2 %vm614_vm1, %v3026_v22 }
 0x227   :  { %2557 = vmatmul.msk.bf16.gmra.mxu2 %vm614_vm1, %v3048_v43 }
 0x237   :  { %2558 = vmatmul.msk.bf16.gmra.mxu2 %vm614_vm1, %v3070_v14 }
 0x23a   :  { %v627_v62 = vpop.f32.mrf.mxu2 }
 0x23b   :  { %v632_v0 = vpack.c.bf16 %v627_v62, %v627_v62 }
 0x23d   :  { %v639_v4 = vunpack.c.l.bf16 %v632_v0 }
 0x23f   :  { %v642_v10 = vadd.f32 %v641_v59, %v639_v4 }
 0x241   :  { %v648_v16 = vmax.f32 %v642_v10, 0.0 }
 0x242   :  { %v629_v5 = vpop.f32.mrf.mxu2 }
 0x243   :  { %v633_v9 = vpack.c.bf16 %v629_v5, %v629_v5 }
 0x245   :  { %v640_v11 = vunpack.c.l.bf16 %v633_v9 }
 0x247   :  { %v643_v15 = vadd.f32 %v641_v59, %v640_v11 }
 0x249   :  { %v649_v17 = vmax.f32 %v643_v15, 0.0 }
 0x24a   :  { %v852_v23 = vpop.f32.mrf.mxu2 }
 0x24b   :  { %v650_v18 = vpack.c.bf16 %v649_v17, %v648_v16 }
 0x24d   :  { %2518 = vmatmul.msk.bf16.vlgmr.msra.gmra.mxu3 %vm688_vm3, %v650_v18 }
 0x24e   :  { %1988 = vmatpush.bf16.msra.mxu3 %v1983_v20 }
 0x252   :  { %v854_v28 = vpop.f32.mrf.mxu2 }
 0x25a   :  { %v857_v34 = vpop.f32.mrf.mxu2 }
 0x25d   :  { %2559 = vmatmul.msk.bf16.vlgmr.msrb.gmra.mxu3 %vm614_vm1, %v3086_v45  ;;  %v2707_v45 = vld [vmem:[%s3759_s12 + $0x18] sm:$0xff] }
 0x25e   :  { %1240 = vmatpush.bf16.msrb.mxu0 %v2707_v45 }
 0x262   :  { %v859_v47 = vpop.f32.mrf.mxu2 }
 0x26a   :  { %v862_v5 = vpop.f32.mrf.mxu2 }
 0x26d   :  { %2560 = vmatmul.msk.bf16.gmra.mxu3 %vm614_vm1, %v3096_v1  ;;  %v2706_v1 = vld [vmem:[%s3759_s12 + $0x10] sm:$0xff] }
 0x26e   :  { %1241 = vmatpush.bf16.msrb.mxu0 %v2706_v1 }
 0x272   :  { %v864_v45 = vpop.f32.mrf.mxu2 }
 0x27d   :  { %2561 = vmatmul.msk.bf16.gmra.mxu3 %vm614_vm1, %v3106_v13  ;;  %v2705_v13 = vld [vmem:[%s3759_s12 + $0x8] sm:$0xff] }
 0x27e   :  { %1242 = vmatpush.bf16.msrb.mxu0 %v2705_v13 }
 0x282   :  { %1243 = vmatpush.bf16.msrb.mxu0 %v2704_v26 }
 0x28d   :  { %2562 = vmatmul.msk.bf16.gmra.mxu3 %vm614_vm1, %v3116_v27  ;;  %v738_v27 = vld [vmem:[%s3758_s11] sm:$0x3] }
 0x28e   :  { %v959_v29 = vperm.slane %v738_v27, 1 }
 0x29d   :  { %2563 = vmatmul.msk.bf16.gmra.mxu3 %vm614_vm1, %v3121_v61 }
 0x2ad   :  { %2564 = vmatmul.msk.bf16.gmra.mxu3 %vm614_vm1, %v3026_v22  ;;  %v714_v22 = vpack.i.b16 %v712_v25, %v712_v25 }
 0x2af   :  { %v716_v30 = vperm.slane %v714_v22, 0 }
 0x2b1   :  { %v719_v61 = vunpack.c.l.bf16 %v716_v30 }
 0x2bd   :  { %2565 = vmatmul.msk.bf16.gmra.mxu3 %vm614_vm1, %v3048_v43  ;;  %v958_v43 = vperm.slane %v738_v27, 0 }
 0x2bf   :  { %v962_v32 = vpack.c.bf16 %v959_v29, %v958_v43  ;;  %v867_v29 = vpop.f32.mrf.mxu2 }
 0x2c1   :  { %v964_v55 = vunpack.c.l.b16 %v962_v32  ;;  %v965_v35 = vunpack.c.h.b16 %v962_v32 }
 0x2c3   :  { %v966_v37 = vpack.c.b16 %v964_v55, %v964_v55  ;;  %v967_v40 = vpack.c.b16 %v965_v35, %v965_v35 }
 0x2c5   :  { %v973_v42 = vpack.i.b16 %v967_v40, %v967_v40 }
 0x2c7   :  { %v975_v50 = vperm.slane %v973_v42, 0 }
 0x2c9   :  { %v3230_v3 = vunpack.c.l.bf16 %v975_v50 }
 0x2cd   :  { %2566 = vmatmul.msk.bf16.gmra.mxu3 %vm614_vm1, %v3070_v14  ;;  %v969_v14 = vpack.i.b16 %v966_v37, %v966_v37 }
 0x2cf   :  { %v971_v49 = vperm.slane %v969_v14, 0 }
 0x2d0   :  { %v705_v63 = vpop.f32.mrf.mxu3 }
 0x2d1   :  { %v710_v31 = vpack.c.bf16 %v705_v63, %v705_v63  ;;  %v3228_v2 = vunpack.c.l.bf16 %v971_v49 }
 0x2d3   :  { %v717_v33 = vunpack.c.l.bf16 %v710_v31 }
 0x2d5   :  { %v720_v6 = vadd.f32 %v719_v61, %v717_v33  ;;  %v2719_v33 = vld [vmem:[%s3761_s14 + $0x30] sm:$0xff] }
 0x2d6   :  { %1760 = vmatpush.bf16.msra.mxu2 %v2719_v33 }
 0x2d7   :  { %v726_v38 = vmax.f32 %v720_v6, 0.0 }
 0x2d8   :  { %v707_v36 = vpop.f32.mrf.mxu3 }
 0x2d9   :  { %v711_v53 = vpack.c.bf16 %v707_v36, %v707_v36  ;;  %v728_v46 = vpack.c.bf16 %v726_v38, %v726_v38 }
 0x2db   :  { %v718_v39 = vunpack.c.l.bf16 %v711_v53  ;;  %v1454_v51 = vunpack.c.l.b16 %v728_v46  ;;  %v869_v53 = vpop.f32.mrf.mxu2 }
 0x2dd   :  { %v721_v41 = vadd.f32 %v719_v61, %v718_v39 }
 0x2df   :  { %v727_v44 = vmax.f32 %v721_v41, 0.0 }
 0x2e0   :  { %v901_v48 = vpop.f32.mrf.mxu3 }
 0x2e1   :  { %v729_v57 = vpack.c.bf16 %v727_v44, %v727_v44  ;;  %v941_v56 = vpack.c.bf16 %v901_v48, %v852_v23 }
 0x2e3   :  { %v1455_v52 = vunpack.c.l.b16 %v729_v57  ;;  %v976_v62 = vunpack.c.l.bf16 %v941_v56  ;;  %v977_v0 = vunpack.c.h.bf16 %v941_v56 }
 0x2e5   :  { %v1456_v54 = vpack.c.b16 %v1455_v52, %v1454_v51  ;;  %v1010_v58 = vadd.f32 %v3228_v2, %v976_v62  ;;  %v1011_v7 = vadd.f32 %v3230_v3, %v977_v0  ;;  %v2718_v51 = vld [vmem:[%s3761_s14 + $0x28] sm:$0xff]  ;;  %v872_v52 = vpop.f32.mrf.mxu2 }
 0x2e6   :  { %1761 = vmatpush.bf16.msra.mxu2 %v2718_v51  ;;  %v2715_v51 = vld [vmem:[%s3761_s14 + $0x10] sm:$0xff] }
 0x2e7   :  { %1457 = vrot.lane.b32.xlu0 %v1456_v54, %s2820_s9  ;;  %v1090_v15 = vmax.f32 %v1010_v58, 0.0  ;;  %v1091_v16 = vmax.f32 %v1011_v7, 0.0 }
 0x2e8   :  { %v903_v4 = vpop.f32.mrf.mxu3 }
 0x2e9   :  { %v942_v59 = vpack.c.bf16 %v903_v4, %v854_v28 }
 0x2eb   :  { %v978_v8 = vunpack.c.l.bf16 %v942_v59  ;;  %v979_v9 = vunpack.c.h.bf16 %v942_v59 }
 0x2ed   :  { %v1012_v10 = vadd.f32 %v3228_v2, %v978_v8  ;;  %v1013_v11 = vadd.f32 %v3230_v3, %v979_v9  ;;  %v874_v9 = vpop.f32.mrf.mxu2 }
 0x2ef   :  { %v1093_v17 = vmax.f32 %v1013_v11, 0.0  ;;  %v1092_v20 = vmax.f32 %v1012_v10, 0.0 }
 0x2f0   :  { %v906_v18 = vpop.f32.mrf.mxu3 }
 0x2f1   :  { %v1122_v60 = vpack.c.bf16 %v1092_v20, %v1090_v15  ;;  %v1123_v19 = vpack.c.bf16 %v1093_v17, %v1091_v16  ;;  %v943_v21 = vpack.c.bf16 %v906_v18, %v857_v34 }
 0x2f3   :  { %1244 = vmatmul.bf16.vlgmr.msrb.gmra.mxu0 %v1122_v60  ;;  %2603 = vmatmul.msk.bf16.vlgmr.msrb.gmra.mxu1 %vm1211_vm4, %v1123_v19  ;;  %v980_v1 = vunpack.c.l.bf16 %v943_v21  ;;  %v981_v13 = vunpack.c.h.bf16 %v943_v21  ;;  %v2717_v19 = vld [vmem:[%s3761_s14 + $0x20] sm:$0xff] }
 0x2f4   :  { %1762 = vmatpush.bf16.msra.mxu2 %v2717_v19 }
 0x2f5   :  { %v1015_v25 = vadd.f32 %v3230_v3, %v981_v13  ;;  %v1014_v27 = vadd.f32 %v3228_v2, %v980_v1 }
 0x2f7   :  { %v1095_v30 = vmax.f32 %v1015_v25, 0.0  ;;  %v1094_v63 = vmax.f32 %v1014_v27, 0.0 }
 0x2f8   :  { %v908_v23 = vpop.f32.mrf.mxu3 }
 0x2f9   :  { %v944_v24 = vpack.c.bf16 %v908_v23, %v859_v47 }
 0x2fb   :  { %v982_v26 = vunpack.c.l.bf16 %v944_v24  ;;  %v983_v22 = vunpack.c.h.bf16 %v944_v24 }
 0x2fd   :  { %v1017_v28 = vadd.f32 %v3230_v3, %v983_v22  ;;  %v1016_v43 = vadd.f32 %v3228_v2, %v982_v26 }
 0x2ff   :  { %v1096_v31 = vmax.f32 %v1016_v43, 0.0  ;;  %v1097_v32 = vmax.f32 %v1017_v28, 0.0 }
 0x300   :  { %v911_v61 = vpop.f32.mrf.mxu3 }
 0x301   :  { %v1124_v34 = vpack.c.bf16 %v1096_v31, %v1094_v63  ;;  %v1125_v55 = vpack.c.bf16 %v1097_v32, %v1095_v30  ;;  %v945_v6 = vpack.c.bf16 %v911_v61, %v862_v5 }
 0x303   :  { %1249 = vmatmul.bf16.gmra.mxu0 %v1124_v34  ;;  %2604 = vmatmul.msk.bf16.gmra.mxu1 %vm1211_vm4, %v1125_v55  ;;  %v984_v35 = vunpack.c.l.bf16 %v945_v6  ;;  %v985_v36 = vunpack.c.h.bf16 %v945_v6  ;;  %v2716_v55 = vld [vmem:[%s3761_s14 + $0x18] sm:$0xff] }
 0x304   :  { %1763 = vmatpush.bf16.msra.mxu2 %v2716_v55 }
 0x305   :  { %v1019_v39 = vadd.f32 %v3230_v3, %v985_v36  ;;  %v1018_v14 = vadd.f32 %v3228_v2, %v984_v35 }
 0x307   :  { %v1099_v46 = vmax.f32 %v1019_v39, 0.0  ;;  %v1098_v47 = vmax.f32 %v1018_v14, 0.0 }
 0x308   :  { %v913_v37 = vpop.f32.mrf.mxu3  ;;  %1764 = vmatpush.bf16.msra.mxu2 %v2715_v51 }
 0x309   :  { %v946_v38 = vpack.c.bf16 %v913_v37, %v864_v45  ;;  %v877_v45 = vpop.f32.mrf.mxu2 }
 0x30b   :  { %v986_v40 = vunpack.c.l.bf16 %v946_v38  ;;  %v987_v41 = vunpack.c.h.bf16 %v946_v38 }
 0x30d   :  { %v1021_v42 = vadd.f32 %v3230_v3, %v987_v41  ;;  %v1020_v44 = vadd.f32 %v3228_v2, %v986_v40 }
 0x30f   :  { %v1100_v48 = vmax.f32 %v1020_v44, 0.0  ;;  %v1101_v57 = vmax.f32 %v1021_v42, 0.0 }
 0x310   :  { %v916_v49 = vpop.f32.mrf.mxu3 }
 0x311   :  { %v1126_v56 = vpack.c.bf16 %v1100_v48, %v1098_v47  ;;  %v1127_v50 = vpack.c.bf16 %v1101_v57, %v1099_v46  ;;  %v947_v54 = vpack.c.bf16 %v916_v49, %v867_v29  ;;  %v879_v32 = vpop.f32.mrf.mxu2 }
 0x313   :  { %1254 = vmatmul.bf16.gmra.mxu0 %v1126_v56  ;;  %2605 = vmatmul.msk.bf16.gmra.mxu1 %vm1211_vm4, %v1127_v50  ;;  %v988_v62 = vunpack.c.l.bf16 %v947_v54  ;;  %v989_v0 = vunpack.c.h.bf16 %v947_v54 }
 0x315   :  { %v1022_v5 = vadd.f32 %v3228_v2, %v988_v62  ;;  %v1023_v58 = vadd.f32 %v3230_v3, %v989_v0  ;;  %v2714_v62 = vld [vmem:[%s3761_s14 + $0x8] sm:$0xff] }
 0x316   :  { %1765 = vmatpush.bf16.msra.mxu2 %v2714_v62 }
 0x317   :  { %v1102_v12 = vmax.f32 %v1022_v5, 0.0  ;;  %v1103_v15 = vmax.f32 %v1023_v58, 0.0 }
 0x318   :  { %v918_v4 = vpop.f32.mrf.mxu3 }
 0x319   :  { %v948_v59 = vpack.c.bf16 %v918_v4, %v869_v53  ;;  %v882_v38 = vpop.f32.mrf.mxu2 }
 0x31b   :  { %v990_v7 = vunpack.c.l.bf16 %v948_v59  ;;  %v991_v8 = vunpack.c.h.bf16 %v948_v59 }
 0x31d   :  { %v1024_v10 = vadd.f32 %v3228_v2, %v990_v7  ;;  %v1025_v11 = vadd.f32 %v3230_v3, %v991_v8 }
 0x31f   :  { %v1105_v16 = vmax.f32 %v1025_v11, 0.0  ;;  %v1104_v17 = vmax.f32 %v1024_v10, 0.0 }
 0x320   :  { %v921_v20 = vpop.f32.mrf.mxu3 }
 0x321   :  { %v1128_v18 = vpack.c.bf16 %v1104_v17, %v1102_v12  ;;  %v1129_v60 = vpack.c.bf16 %v1105_v16, %v1103_v15  ;;  %v949_v21 = vpack.c.bf16 %v921_v20, %v872_v52  ;;  %v884_v54 = vpop.f32.mrf.mxu2 }
 0x323   :  { %1259 = vmatmul.bf16.gmra.mxu0 %v1128_v18  ;;  %2606 = vmatmul.msk.bf16.gmra.mxu1 %vm1211_vm4, %v1129_v60  ;;  %v992_v1 = vunpack.c.l.bf16 %v949_v21  ;;  %v993_v13 = vunpack.c.h.bf16 %v949_v21 }
 0x325   :  { %v1026_v25 = vadd.f32 %v3228_v2, %v992_v1  ;;  %v1027_v26 = vadd.f32 %v3230_v3, %v993_v13 }
 0x327   :  { %v1106_v29 = vmax.f32 %v1026_v25, 0.0  ;;  %v1107_v30 = vmax.f32 %v1027_v26, 0.0 }
 0x328   :  { %v923_v23 = vpop.f32.mrf.mxu3 }
 0x329   :  { %v950_v24 = vpack.c.bf16 %v923_v23, %v874_v9  ;;  %v887_v12 = vpop.f32.mrf.mxu2 }
 0x32b   :  { %v994_v22 = vunpack.c.l.bf16 %v950_v24  ;;  %v995_v27 = vunpack.c.h.bf16 %v950_v24 }
 0x32d   :  { %v1028_v28 = vadd.f32 %v3228_v2, %v994_v22  ;;  %v1029_v43 = vadd.f32 %v3230_v3, %v995_v27 }
 0x32f   :  { %v1108_v63 = vmax.f32 %v1028_v28, 0.0  ;;  %v1109_v31 = vmax.f32 %v1029_v43, 0.0 }
 0x330   :  { %v926_v33 = vpop.f32.mrf.mxu3 }
 0x331   :  { %v1131_v61 = vpack.c.bf16 %v1109_v31, %v1107_v30  ;;  %v1130_v34 = vpack.c.bf16 %v1108_v63, %v1106_v29  ;;  %v951_v6 = vpack.c.bf16 %v926_v33, %v877_v45  ;;  %v889_v13 = vpop.f32.mrf.mxu2 }
 0x333   :  { %1264 = vmatmul.bf16.gmra.mxu0 %v1130_v34  ;;  %2607 = vmatmul.msk.bf16.gmra.mxu1 %vm1211_vm4, %v1131_v61  ;;  %v996_v35 = vunpack.c.l.bf16 %v951_v6  ;;  %v997_v36 = vunpack.c.h.bf16 %v951_v6  ;;  %v1156_v61 = vld [vmem:[%s3760_s13] sm:$0x1] }
 0x334   :  { %v1350_v34 = vpack.c.bf16 %v1156_v61, %v1156_v61 }
 0x335   :  { %v1030_v39 = vadd.f32 %v3228_v2, %v996_v35  ;;  %v1031_v40 = vadd.f32 %v3230_v3, %v997_v36 }
 0x337   :  { %v1110_v46 = vmax.f32 %v1030_v39, 0.0  ;;  %v1111_v47 = vmax.f32 %v1031_v40, 0.0 }
 0x338   :  { %v928_v53 = vpop.f32.mrf.mxu3 }
 0x339   :  { %v952_v37 = vpack.c.bf16 %v928_v53, %v879_v32 }
 0x33b   :  { %v998_v41 = vunpack.c.l.bf16 %v952_v37  ;;  %v999_v14 = vunpack.c.h.bf16 %v952_v37 }
 0x33d   :  { %v1032_v42 = vadd.f32 %v3228_v2, %v998_v41  ;;  %v1033_v44 = vadd.f32 %v3230_v3, %v999_v14 }
 0x33f   :  { %v1112_v48 = vmax.f32 %v1032_v42, 0.0  ;;  %v1113_v57 = vmax.f32 %v1033_v44, 0.0 }
 0x340   :  { %v931_v49 = vpop.f32.mrf.mxu3 }
 0x341   :  { %v1133_v56 = vpack.c.bf16 %v1113_v57, %v1111_v47  ;;  %v1132_v50 = vpack.c.bf16 %v1112_v48, %v1110_v46  ;;  %v953_v52 = vpack.c.bf16 %v931_v49, %v882_v38 }
 0x343   :  { %1269 = vmatmul.bf16.gmra.mxu0 %v1132_v50  ;;  %2608 = vmatmul.msk.bf16.gmra.mxu1 %vm1211_vm4, %v1133_v56  ;;  %v1000_v0 = vunpack.c.l.bf16 %v953_v52  ;;  %v1001_v4 = vunpack.c.h.bf16 %v953_v52 }
 0x345   :  { %v1034_v58 = vadd.f32 %v3228_v2, %v1000_v0  ;;  %v1035_v7 = vadd.f32 %v3230_v3, %v1001_v4 }
 0x347   :  { %v1114_v15 = vmax.f32 %v1034_v58, 0.0  ;;  %v1115_v16 = vmax.f32 %v1035_v7, 0.0 }
 0x348   :  { %v933_v59 = vpop.f32.mrf.mxu3 }
 0x349   :  { %v954_v5 = vpack.c.bf16 %v933_v59, %v884_v54 }
 0x34b   :  { %v1002_v8 = vunpack.c.l.bf16 %v954_v5  ;;  %v1003_v9 = vunpack.c.h.bf16 %v954_v5 }
 0x34d   :  { %v1036_v10 = vadd.f32 %v3228_v2, %v1002_v8  ;;  %v1037_v11 = vadd.f32 %v3230_v3, %v1003_v9 }
 0x34f   :  { %v1116_v17 = vmax.f32 %v1036_v10, 0.0  ;;  %v1117_v20 = vmax.f32 %v1037_v11, 0.0 }
 0x350   :  { %v936_v18 = vpop.f32.mrf.mxu3 }
 0x351   :  { %v1135_v60 = vpack.c.bf16 %v1117_v20, %v1115_v16  ;;  %v1134_v19 = vpack.c.bf16 %v1116_v17, %v1114_v15  ;;  %v955_v21 = vpack.c.bf16 %v936_v18, %v887_v12 }
 0x353   :  { %1274 = vmatmul.bf16.gmra.mxu0 %v1134_v19  ;;  %2609 = vmatmul.msk.bf16.gmra.mxu1 %vm1211_vm4, %v1135_v60  ;;  %v1004_v45 = vunpack.c.l.bf16 %v955_v21  ;;  %v1005_v1 = vunpack.c.h.bf16 %v955_v21 }
 0x355   :  { %v1038_v25 = vadd.f32 %v3228_v2, %v1004_v45  ;;  %v1039_v26 = vadd.f32 %v3230_v3, %v1005_v1 }
 0x357   :  { %v1118_v29 = vmax.f32 %v1038_v25, 0.0  ;;  %v1119_v30 = vmax.f32 %v1039_v26, 0.0 }
 0x358   :  { %v938_v23 = vpop.f32.mrf.mxu3 }
 0x359   :  { %v956_v24 = vpack.c.bf16 %v938_v23, %v889_v13  ;;  %v1458_v55 = vpop.permute.xlu0 %1457 }
 0x35a   :  { %v3300_v6 = vsel %vm614_vm1, 0, %v1458_v55 }
 0x35b   :  { %v1006_v22 = vunpack.c.l.bf16 %v956_v24  ;;  %v1007_v27 = vunpack.c.h.bf16 %v956_v24  ;;  %v2611_v38 = vpack.i.b16 %v3300_v6, %v3300_v6  ;;  %v1471_v39 = vunpack.i.h.s16 %v3300_v6 }
 0x35c   :  { %v1463_v54 = vrot.slane %v3300_v6, 1 }
 0x35d   :  { %v1040_v28 = vadd.f32 %v3228_v2, %v1006_v22  ;;  %v1041_v43 = vadd.f32 %v3230_v3, %v1007_v27  ;;  %v2713_v2 = vld [vmem:[%s3761_s14] sm:$0xff]  ;;  %v1352_v3 = vpack.i.b16 %v1350_v34, %v1350_v34  ;;  %v1502_v42 = vperm.slane %v2611_v38, 0 }
 0x35e   :  { %1766 = vmatpush.bf16.msra.mxu2 %v2713_v2  ;;  %v1487_v44 = vpack.i.b16 %v1471_v39, %v1471_v39  ;;  %v1473_v8 = vunpack.i.h.s16 %v1463_v54  ;;  %v2612_v9 = vpack.i.b16 %v1463_v54, %v1463_v54 }
 0x35f   :  { %v1120_v63 = vmax.f32 %v1040_v28, 0.0  ;;  %v1121_v31 = vmax.f32 %v1041_v43, 0.0  ;;  %v1354_v35 = vperm.slane %v1352_v3, 0  ;;  %v1519_v49 = vpack.i.b16 %v1502_v42, %v1502_v42 }
 0x360   :  { %v1503_v50 = vperm.slane %v1487_v44, 0  ;;  %v1489_v18 = vpack.i.b16 %v1473_v8, %v1473_v8  ;;  %v1504_v45 = vperm.slane %v2612_v9, 0 }
 0x361   :  { %v1137_v32 = vpack.c.bf16 %v1121_v31, %v1119_v30  ;;  %v1136_v33 = vpack.c.bf16 %v1120_v63, %v1118_v29  ;;  %v3305_v41 = vunpack.c.l.bf16 %v1354_v35  ;;  %v1521_v62 = vperm.slane %v1519_v49, 0 }
 0x362   :  { %v1523_v4 = vpack.i.b16 %v1503_v50, %v1503_v50  ;;  %v1505_v26 = vperm.slane %v1489_v18, 0  ;;  %v1527_v43 = vpack.i.b16 %v1504_v45, %v1504_v45 }
 0x363   :  { %1279 = vmatmul.bf16.gmra.mxu0 %v1136_v33  ;;  %2610 = vmatmul.msk.bf16.gmra.mxu1 %vm1211_vm4, %v1137_v32  ;;  %v1582_v10 = vunpack.c.l.bf16 %v1521_v62  ;;  %v1464_v32 = vrot.slane %v3300_v6, 2 }
 0x364   :  { %v1525_v12 = vperm.slane %v1523_v4, 0  ;;  %v1529_v34 = vperm.slane %v1527_v43, 0  ;;  %v1531_v2 = vpack.i.b16 %v1505_v26, %v1505_v26 }
 0x366   :  { %v1583_v60 = vunpack.c.l.bf16 %v1525_v12 }
 0x370   :  { %v1245_v36 = vpop.f32.mrf.mxu0  ;;  %v1294_v53 = vpop.f32.mrf.mxu1 }
 0x371   :  { %v1295_v37 = vadd.f32 %v1294_v53, %v1245_v36  ;;  %v1475_v53 = vunpack.i.h.s16 %v1464_v32 }
 0x373   :  { %v1334_v40 = vpack.c.bf16 %v1295_v37, %v1295_v37  ;;  %v2613_v37 = vpack.i.b16 %v1464_v32, %v1464_v32 }
 0x375   :  { %v1355_v14 = vunpack.c.l.bf16 %v1334_v40  ;;  %v1533_v40 = vperm.slane %v1531_v2, 0 }
 0x377   :  { %v1372_v46 = vadd.f32 %v3305_v41, %v1355_v14  ;;  %v1584_v14 = vunpack.c.l.bf16 %v1529_v34  ;;  %v1585_v49 = vunpack.c.l.bf16 %v1533_v40  ;;  %v2724_v34 = vld [vmem:[%s3763_s16 + $0x18] sm:$0xff] }
 0x378   :  { %v1247_v47 = vpop.f32.mrf.mxu0  ;;  %v1296_v48 = vpop.f32.mrf.mxu1  ;;  %1989 = vmatpush.bf16.msra.mxu3 %v2724_v34 }
 0x379   :  { %v1420_v57 = vmax.f32 %v1372_v46, 0.0  ;;  %v1297_v56 = vadd.f32 %v1296_v48, %v1247_v47  ;;  %v1491_v47 = vpack.i.b16 %v1475_v53, %v1475_v53 }
 0x37b   :  { %v3308_v51 = vpack.c.bf16 %v1420_v57, %v1420_v57  ;;  %v1335_v52 = vpack.c.bf16 %v1297_v56, %v1297_v56  ;;  %v1506_v56 = vperm.slane %v2613_v37, 0  ;;  %v1507_v4 = vperm.slane %v1491_v47, 0 }
 0x37d   :  { %v1356_v0 = vunpack.c.l.bf16 %v1335_v52  ;;  %v1598_v59 = vunpack.c.l.bf16 %v3308_v51  ;;  %v1535_v8 = vpack.i.b16 %v1506_v56, %v1506_v56 }
 0x37f   :  { %v1373_v5 = vadd.f32 %v3305_v41, %v1356_v0  ;;  %v1614_v16 = vsub.f32 %v1582_v10, %v1598_v59  ;;  %v1537_v18 = vperm.slane %v1535_v8, 0 }
 0x380   :  { %v1250_v58 = vpop.f32.mrf.mxu0  ;;  %v1299_v7 = vpop.f32.mrf.mxu1 }
 0x381   :  { %v1421_v11 = vmax.f32 %v1373_v5, 0.0  ;;  %v1300_v15 = vadd.f32 %v1299_v7, %v1250_v58  ;;  %v1630_v1 = vpack.c.bf16 %v1614_v16, %v1614_v16 }
 0x383   :  { %v3315_v17 = vpack.c.bf16 %v1421_v11, %v1421_v11  ;;  %v1336_v20 = vpack.c.bf16 %v1300_v15, %v1300_v15  ;;  %v1679_v29 = vunpack.c.l.b16 %v1630_v1  ;;  %v1465_v15 = vrot.slane %v3300_v6, 3 }
 0x385   :  { %v1599_v19 = vunpack.c.l.bf16 %v3315_v17  ;;  %v1357_v21 = vunpack.c.l.bf16 %v1336_v20 }
 0x387   :  { %v1615_v13 = vsub.f32 %v1583_v60, %v1599_v19  ;;  %v1374_v23 = vadd.f32 %v3305_v41, %v1357_v21  ;;  %v1539_v60 = vpack.i.b16 %v1507_v4, %v1507_v4 }
 0x388   :  { %v1252_v24 = vpop.f32.mrf.mxu0  ;;  %v1301_v25 = vpop.f32.mrf.mxu1 }
 0x389   :  { %v1631_v22 = vpack.c.bf16 %v1615_v13, %v1615_v13  ;;  %v1422_v27 = vmax.f32 %v1374_v23, 0.0  ;;  %v1302_v28 = vadd.f32 %v1301_v25, %v1252_v24  ;;  %v1477_v23 = vunpack.i.h.s16 %v1465_v15 }
 0x38a   :  { %v2614_v24 = vpack.i.b16 %v1465_v15, %v1465_v15 }
 0x38b   :  { %v1680_v30 = vunpack.c.l.b16 %v1631_v22  ;;  %v3321_v63 = vpack.c.bf16 %v1422_v27, %v1422_v27  ;;  %v1337_v31 = vpack.c.bf16 %v1302_v28, %v1302_v28  ;;  %v1541_v22 = vperm.slane %v1539_v60, 0 }
 0x38c   :  { %v1586_v27 = vunpack.c.l.bf16 %v1537_v18 }
 0x38d   :  { %v1358_v33 = vunpack.c.l.bf16 %v1337_v31  ;;  %v1695_v61 = vpack.c.b16 %v1680_v30, %v1679_v29  ;;  %v1600_v55 = vunpack.c.l.bf16 %v3321_v63  ;;  %v1493_v30 = vpack.i.b16 %v1477_v23, %v1477_v23 }
 0x38f   :  { %v1375_v3 = vadd.f32 %v3305_v41, %v1358_v33  ;;  %1767 = vmatmul.bf16.vlgmr.msra.gmra.mxu2 %v1695_v61  ;;  %v1616_v46 = vsub.f32 %v1584_v14, %v1600_v55  ;;  %v1587_v33 = vunpack.c.l.bf16 %v1541_v22  ;;  %v1508_v61 = vperm.slane %v2614_v24, 0 }
 0x390   :  { %v1255_v35 = vpop.f32.mrf.mxu0  ;;  %v1304_v36 = vpop.f32.mrf.mxu1  ;;  %v1509_v37 = vperm.slane %v1493_v30, 0 }
 0x391   :  { %v1423_v38 = vmax.f32 %v1375_v3, 0.0  ;;  %v1305_v39 = vadd.f32 %v1304_v36, %v1255_v35  ;;  %v1632_v54 = vpack.c.bf16 %v1616_v46, %v1616_v46  ;;  %v1543_v14 = vpack.i.b16 %v1508_v61, %v1508_v61 }
 0x393   :  { %v3326_v42 = vpack.c.bf16 %v1423_v38, %v1423_v38  ;;  %v1338_v44 = vpack.c.bf16 %v1305_v39, %v1305_v39  ;;  %v1681_v11 = vunpack.c.l.b16 %v1632_v54  ;;  %v1547_v54 = vpack.i.b16 %v1509_v37, %v1509_v37 }
 0x395   :  { %v1601_v48 = vunpack.c.l.bf16 %v3326_v42  ;;  %v1359_v57 = vunpack.c.l.bf16 %v1338_v44 }
 0x397   :  { %v1376_v50 = vadd.f32 %v3305_v41, %v1359_v57  ;;  %v1617_v52 = vsub.f32 %v1585_v49, %v1601_v48  ;;  %v1466_v49 = vrot.slane %v3300_v6, 4 }
 0x398   :  { %v1257_v62 = vpop.f32.mrf.mxu0  ;;  %v1306_v0 = vpop.f32.mrf.mxu1 }
 0x399   :  { %v1424_v5 = vmax.f32 %v1376_v50, 0.0  ;;  %v1307_v58 = vadd.f32 %v1306_v0, %v1257_v62  ;;  %v1633_v7 = vpack.c.bf16 %v1617_v52, %v1617_v52  ;;  %v1545_v52 = vperm.slane %v1543_v14, 0 }
 0x39b   :  { %v3334_v9 = vpack.c.bf16 %v1424_v5, %v1424_v5  ;;  %v1339_v10 = vpack.c.bf16 %v1307_v58, %v1307_v58  ;;  %v1682_v12 = vunpack.c.l.b16 %v1633_v7  ;;  %v1479_v58 = vunpack.i.h.s16 %v1466_v49 }
 0x39c   :  { %v2615_v7 = vpack.i.b16 %v1466_v49, %v1466_v49 }
 0x39d   :  { %v1360_v16 = vunpack.c.l.bf16 %v1339_v10  ;;  %v1696_v20 = vpack.c.b16 %v1682_v12, %v1681_v11  ;;  %v1602_v21 = vunpack.c.l.bf16 %v3334_v9  ;;  %v1549_v11 = vperm.slane %v1547_v54, 0 }
 0x39e   :  { %v1588_v12 = vunpack.c.l.bf16 %v1545_v52  ;;  %v1495_v18 = vpack.i.b16 %v1479_v58, %v1479_v58 }
 0x39f   :  { %v1377_v45 = vadd.f32 %v3305_v41, %v1360_v16  ;;  %1772 = vmatmul.bf16.gmra.mxu2 %v1696_v20  ;;  %v1618_v29 = vsub.f32 %v1586_v27, %v1602_v21 }
 0x3a0   :  { %v1260_v1 = vpop.f32.mrf.mxu0  ;;  %v1309_v13 = vpop.f32.mrf.mxu1  ;;  %v1511_v27 = vperm.slane %v1495_v18, 0 }
 0x3a1   :  { %v1425_v25 = vmax.f32 %v1377_v45, 0.0  ;;  %v1310_v26 = vadd.f32 %v1309_v13, %v1260_v1  ;;  %v1634_v35 = vpack.c.bf16 %v1618_v29, %v1618_v29  ;;  %v1589_v1 = vunpack.c.l.bf16 %v1549_v11 }
 0x3a2   :  { %v1510_v13 = vperm.slane %v2615_v7, 0  ;;  %v1555_v37 = vpack.i.b16 %v1511_v27, %v1511_v27 }
 0x3a3   :  { %v3339_v28 = vpack.c.bf16 %v1425_v25, %v1425_v25  ;;  %v1340_v43 = vpack.c.bf16 %v1310_v26, %v1310_v26  ;;  %v1683_v47 = vunpack.c.l.b16 %v1634_v35 }
 0x3a5   :  { %v1603_v31 = vunpack.c.l.bf16 %v3339_v28  ;;  %v1361_v32 = vunpack.c.l.bf16 %v1340_v43 }
 0x3a7   :  { %v1378_v2 = vadd.f32 %v3305_v41, %v1361_v32  ;;  %v1619_v3 = vsub.f32 %v1587_v33, %v1603_v31  ;;  %v1551_v32 = vpack.i.b16 %v1510_v13, %v1510_v13 }
 0x3a8   :  { %v1262_v36 = vpop.f32.mrf.mxu0  ;;  %v1311_v53 = vpop.f32.mrf.mxu1 }
 0x3a9   :  { %v1426_v38 = vmax.f32 %v1378_v2, 0.0  ;;  %v1312_v39 = vadd.f32 %v1311_v53, %v1262_v36  ;;  %v1635_v40 = vpack.c.bf16 %v1619_v3, %v1619_v3  ;;  %v1467_v3 = vrot.slane %v3300_v6, 5 }
 0x3aa   :  { %v1553_v53 = vperm.slane %v1551_v32, 0 }
 0x3ab   :  { %v3350_v44 = vpack.c.bf16 %v1426_v38, %v1426_v38  ;;  %v1341_v46 = vpack.c.bf16 %v1312_v39, %v1312_v39  ;;  %v1684_v57 = vunpack.c.l.b16 %v1635_v40 }
 0x3ad   :  { %v1362_v56 = vunpack.c.l.bf16 %v1341_v46  ;;  %v1697_v50 = vpack.c.b16 %v1684_v57, %v1683_v47  ;;  %v1604_v62 = vunpack.c.l.bf16 %v3350_v44  ;;  %v1481_v46 = vunpack.i.h.s16 %v1467_v3 }
 0x3ae   :  { %v2616_v47 = vpack.i.b16 %v1467_v3, %v1467_v3 }
 0x3af   :  { %v1379_v0 = vadd.f32 %v3305_v41, %v1362_v56  ;;  %1777 = vmatmul.bf16.gmra.mxu2 %v1697_v50  ;;  %v1620_v20 = vsub.f32 %v1588_v12, %v1604_v62  ;;  %v1557_v56 = vperm.slane %v1555_v37, 0  ;;  %v1590_v50 = vunpack.c.l.bf16 %v1553_v53 }
 0x3b0   :  { %v1265_v4 = vpop.f32.mrf.mxu0  ;;  %v1314_v5 = vpop.f32.mrf.mxu1 }
 0x3b1   :  { %v1427_v8 = vmax.f32 %v1379_v0, 0.0  ;;  %v1315_v10 = vadd.f32 %v1314_v5, %v1265_v4  ;;  %v1636_v25 = vpack.c.bf16 %v1620_v20, %v1620_v20  ;;  %v1497_v4 = vpack.i.b16 %v1481_v46, %v1481_v46 }
 0x3b2   :  { %v1591_v7 = vunpack.c.l.bf16 %v1557_v56 }
 0x3b3   :  { %v3355_v15 = vpack.c.bf16 %v1427_v8, %v1427_v8  ;;  %v1342_v16 = vpack.c.bf16 %v1315_v10, %v1315_v10  ;;  %v1685_v34 = vunpack.c.l.b16 %v1636_v25  ;;  %v2723_v8 = vld [vmem:[%s3763_s16 + $0x10] sm:$0xff]  ;;  %v1512_v10 = vperm.slane %v2616_v47, 0 }
 0x3b4   :  { %1990 = vmatpush.bf16.msra.mxu3 %v2723_v8 }
 0x3b5   :  { %v3770_v60 = vunpack.c.l.bf16 %v3355_v15  ;;  %v1363_v45 = vunpack.c.l.bf16 %v1342_v16 }
 0x3b7   :  { %v1380_v23 = vadd.f32 %v3305_v41, %v1363_v45  ;;  %v1621_v24 = vsub.f32 %v1589_v1, %v3770_v60  ;;  %v1513_v45 = vperm.slane %v1497_v4, 0  ;;  %v2722_v4 = vld [vmem:[%s3763_s16 + $0x8] sm:$0xff] }
 0x3b8   :  { %v1267_v26 = vpop.f32.mrf.mxu0  ;;  %v1316_v22 = vpop.f32.mrf.mxu1  ;;  %1991 = vmatpush.bf16.msra.mxu3 %v2722_v4 }
 0x3b9   :  { %v1428_v43 = vmax.f32 %v1380_v23, 0.0  ;;  %v1317_v29 = vadd.f32 %v1316_v22, %v1267_v26  ;;  %v1637_v30 = vpack.c.bf16 %v1621_v24, %v1621_v24  ;;  %v1559_v24 = vpack.i.b16 %v1512_v10, %v1512_v10 }
 0x3bb   :  { %v3363_v33 = vpack.c.bf16 %v1428_v43, %v1428_v43  ;;  %v1343_v61 = vpack.c.bf16 %v1317_v29, %v1317_v29  ;;  %v1686_v2 = vunpack.c.l.b16 %v1637_v30  ;;  %v1468_v43 = vrot.slane %v3300_v6, 6 }
 0x3bc   :  { %v1561_v32 = vperm.slane %v1559_v24, 0 }
 0x3bd   :  { %v1364_v35 = vunpack.c.l.bf16 %v1343_v61  ;;  %v1698_v36 = vpack.c.b16 %v1686_v2, %v1685_v34  ;;  %v3774_v38 = vunpack.c.l.bf16 %v3363_v33  ;;  %v1563_v61 = vpack.i.b16 %v1513_v45, %v1513_v45 }
 0x3be   :  { %v2617_v53 = vpack.i.b16 %v1468_v43, %v1468_v43 }
 0x3bf   :  { %v1381_v39 = vadd.f32 %v3305_v41, %v1364_v35  ;;  %1782 = vmatmul.bf16.gmra.mxu2 %v1698_v36  ;;  %v1622_v0 = vsub.f32 %v1590_v50, %v3774_v38  ;;  %v1483_v36 = vunpack.i.h.s16 %v1468_v43 }
 0x3c0   :  { %v1270_v40 = vpop.f32.mrf.mxu0  ;;  %v1319_v14 = vpop.f32.mrf.mxu1 }
 0x3c1   :  { %v1429_v57 = vmax.f32 %v1381_v39, 0.0  ;;  %v1320_v49 = vadd.f32 %v1319_v14, %v1270_v40  ;;  %v1638_v16 = vpack.c.bf16 %v1622_v0, %v1622_v0  ;;  %v1565_v40 = vperm.slane %v1563_v61, 0  ;;  %v2721_v61 = vld [vmem:[%s3763_s16] sm:$0xff] }
 0x3c2   :  { %v1592_v14 = vunpack.c.l.bf16 %v1561_v32  ;;  %v1514_v0 = vperm.slane %v2617_v53, 0  ;;  %1992 = vmatpush.bf16.msra.mxu3 %v2721_v61 }
 0x3c3   :  { %v3368_v52 = vpack.c.bf16 %v1429_v57, %v1429_v57  ;;  %v1344_v54 = vpack.c.bf16 %v1320_v49, %v1320_v49  ;;  %v1687_v22 = vunpack.c.l.b16 %v1638_v16  ;;  %v1499_v49 = vpack.i.b16 %v1483_v36, %v1483_v36 }
 0x3c4   :  { %v1567_v45 = vpack.i.b16 %v1514_v0, %v1514_v0 }
 0x3c5   :  { %v3776_v5 = vunpack.c.l.bf16 %v3368_v52  ;;  %v1365_v58 = vunpack.c.l.bf16 %v1344_v54  ;;  %v1593_v54 = vunpack.c.l.bf16 %v1565_v40 }
 0x3c6   :  { %v1569_v43 = vperm.slane %v1567_v45, 0 }
 0x3c7   :  { %v1382_v11 = vadd.f32 %v3305_v41, %v1365_v58  ;;  %v1623_v12 = vsub.f32 %v1591_v7, %v3776_v5 }
 0x3c8   :  { %v1272_v20 = vpop.f32.mrf.mxu0  ;;  %v1321_v18 = vpop.f32.mrf.mxu1 }
 0x3c9   :  { %v1430_v1 = vmax.f32 %v1382_v11, 0.0  ;;  %v1322_v13 = vadd.f32 %v1321_v18, %v1272_v20  ;;  %v1639_v23 = vpack.c.bf16 %v1623_v12, %v1623_v12  ;;  %v1515_v12 = vperm.slane %v1499_v49, 0 }
 0x3cb   :  { %v3379_v25 = vpack.c.bf16 %v1430_v1, %v1430_v1  ;;  %v1345_v26 = vpack.c.bf16 %v1322_v13, %v1322_v13  ;;  %v1688_v27 = vunpack.c.l.b16 %v1639_v23 }
 0x3cd   :  { %v1366_v29 = vunpack.c.l.bf16 %v1345_v26  ;;  %v1699_v30 = vpack.c.b16 %v1688_v27, %v1687_v22  ;;  %v3775_v34 = vunpack.c.l.bf16 %v3379_v25  ;;  %v1469_v26 = vrot.slane %v3300_v6, 7 }
 0x3cf   :  { %v1383_v2 = vadd.f32 %v3305_v41, %v1366_v29  ;;  %1787 = vmatmul.bf16.gmra.mxu2 %v1699_v30  ;;  %v1624_v57 = vsub.f32 %v1592_v14, %v3775_v34  ;;  %v1571_v29 = vpack.i.b16 %v1515_v12, %v1515_v12  ;;  %v2618_v36 = vpack.i.b16 %v1469_v26, %v1469_v26 }
 0x3d0   :  { %v1275_v3 = vpop.f32.mrf.mxu0  ;;  %v1324_v35 = vpop.f32.mrf.mxu1 }
 0x3d1   :  { %v1431_v37 = vmax.f32 %v1383_v2, 0.0  ;;  %v1325_v39 = vadd.f32 %v1324_v35, %v1275_v3  ;;  %v1640_v8 = vpack.c.bf16 %v1624_v57, %v1624_v57  ;;  %v1485_v35 = vunpack.i.h.s16 %v1469_v26 }
 0x3d2   :  { %v1573_v6 = vperm.slane %v1571_v29, 0  ;;  %v1516_v0 = vperm.slane %v2618_v36, 0 }
 0x3d3   :  { %v3384_v46 = vpack.c.bf16 %v1431_v37, %v1431_v37  ;;  %v1346_v47 = vpack.c.bf16 %v1325_v39, %v1325_v39  ;;  %v1689_v23 = vunpack.c.l.b16 %v1640_v8  ;;  %v1594_v39 = vunpack.c.l.bf16 %v1569_v43 }
 0x3d4   :  { %v1501_v57 = vpack.i.b16 %v1485_v35, %v1485_v35 }
 0x3d5   :  { %v3773_v56 = vunpack.c.l.bf16 %v3384_v46  ;;  %v1367_v50 = vunpack.c.l.bf16 %v1346_v47 }
 0x3d7   :  { %v1384_v58 = vadd.f32 %v3305_v41, %v1367_v50  ;;  %v1625_v7 = vsub.f32 %v1593_v54, %v3773_v56  ;;  %v1595_v54 = vunpack.c.l.bf16 %v1573_v6 }
 0x3d8   :  { %v1277_v10 = vpop.f32.mrf.mxu0  ;;  %v1326_v11 = vpop.f32.mrf.mxu1 }
 0x3d9   :  { %v1432_v16 = vmax.f32 %v1384_v58, 0.0  ;;  %v1327_v20 = vadd.f32 %v1326_v11, %v1277_v10  ;;  %v1641_v18 = vpack.c.bf16 %v1625_v7, %v1625_v7  ;;  %v1517_v11 = vperm.slane %v1501_v57, 0 }
 0x3db   :  { %v3395_v1 = vpack.c.bf16 %v1432_v16, %v1432_v16  ;;  %v1347_v13 = vpack.c.bf16 %v1327_v20, %v1327_v20  ;;  %v1690_v24 = vunpack.c.l.b16 %v1641_v18  ;;  %v1575_v18 = vpack.i.b16 %v1516_v0, %v1516_v0 }
 0x3dc   :  { %v1579_v43 = vpack.i.b16 %v1517_v11, %v1517_v11 }
 0x3dd   :  { %v1368_v22 = vunpack.c.l.bf16 %v1347_v13  ;;  %v1700_v27 = vpack.c.b16 %v1690_v24, %v1689_v23  ;;  %v3772_v30 = vunpack.c.l.bf16 %v3395_v1 }
 0x3df   :  { %v1385_v32 = vadd.f32 %v3305_v41, %v1368_v22  ;;  %1792 = vmatmul.bf16.gmra.mxu2 %v1700_v27  ;;  %v1626_v47 = vsub.f32 %v1594_v39, %v3772_v30  ;;  %v1577_v27 = vperm.slane %v1575_v18, 0 }
 0x3e0   :  { %v1280_v2 = vpop.f32.mrf.mxu0  ;;  %v1329_v3 = vpop.f32.mrf.mxu1 }
 0x3e1   :  { %v1433_v53 = vmax.f32 %v1385_v32, 0.0  ;;  %v1330_v37 = vadd.f32 %v1329_v3, %v1280_v2  ;;  %v1642_v7 = vpack.c.bf16 %v1626_v47, %v1626_v47  ;;  %v1581_v2 = vperm.slane %v1579_v43, 0 }
 0x3e2   :  { %v1596_v3 = vunpack.c.l.bf16 %v1577_v27 }
 0x3e3   :  { %v3403_v40 = vpack.c.bf16 %v1433_v53, %v1433_v53  ;;  %v1348_v14 = vpack.c.bf16 %v1330_v37, %v1330_v37  ;;  %v1691_v23 = vunpack.c.l.b16 %v1642_v7  ;;  %v1597_v37 = vunpack.c.l.bf16 %v1581_v2 }
 0x3e5   :  { %v3771_v49 = vunpack.c.l.bf16 %v3403_v40  ;;  %v1369_v50 = vunpack.c.l.bf16 %v1348_v14 }
 0x3e7   :  { %v1386_v4 = vadd.f32 %v3305_v41, %v1369_v50  ;;  %v1627_v58 = vsub.f32 %v1595_v54, %v3771_v49  ;;  %v1662_v50 = vld [vmem:[%s3762_s15] sm:$0x1] }
 0x3e8   :  { %v1282_v8 = vpop.f32.mrf.mxu0  ;;  %v1331_v10 = vpop.f32.mrf.mxu1  ;;  %v1824_v54 = vpack.c.bf16 %v1662_v50, %v1662_v50 }
 0x3e9   :  { %v1434_v12 = vmax.f32 %v1386_v4, 0.0  ;;  %v1332_v16 = vadd.f32 %v1331_v10, %v1282_v8  ;;  %v1643_v20 = vpack.c.bf16 %v1627_v58, %v1627_v58 }
 0x3ea   :  { %v1826_v0 = vpack.i.b16 %v1824_v54, %v1824_v54 }
 0x3eb   :  { %v3411_v45 = vpack.c.bf16 %v1434_v12, %v1434_v12  ;;  %v1349_v13 = vpack.c.bf16 %v1332_v16, %v1332_v16  ;;  %v1692_v24 = vunpack.c.l.b16 %v1643_v20 }
 0x3ec   :  { %v1828_v7 = vperm.slane %v1826_v0, 0 }
 0x3ed   :  { %v1370_v26 = vunpack.c.l.bf16 %v1349_v13  ;;  %v1701_v22 = vpack.c.b16 %v1692_v24, %v1691_v23  ;;  %v3769_v29 = vunpack.c.l.bf16 %v3411_v45 }
 0x3ee   :  { %v3425_v10 = vunpack.c.l.bf16 %v1828_v7 }
 0x3ef   :  { %v1387_v32 = vadd.f32 %v3305_v41, %v1370_v26  ;;  %1797 = vmatmul.bf16.gmra.mxu2 %v1701_v22  ;;  %v1628_v36 = vsub.f32 %v1596_v3, %v3769_v29 }
 0x3f1   :  { %v1435_v61 = vmax.f32 %v1387_v32, 0.0  ;;  %v1644_v39 = vpack.c.bf16 %v1628_v36, %v1628_v36 }
 0x3f3   :  { %v3415_v35 = vpack.c.bf16 %v1435_v61, %v1435_v61  ;;  %v1693_v47 = vunpack.c.l.b16 %v1644_v39 }
 0x3f5   :  { %v3768_v53 = vunpack.c.l.bf16 %v3415_v35 }
 0x3f7   :  { %v1629_v6 = vsub.f32 %v1597_v37, %v3768_v53 }
 0x3f9   :  { %v1645_v14 = vpack.c.bf16 %v1629_v6, %v1629_v6 }
 0x3fb   :  { %v1694_v57 = vunpack.c.l.b16 %v1645_v14 }
 0x3fd   :  { %v1702_v41 = vpack.c.b16 %v1694_v57, %v1693_v47 }
 0x3ff   :  { %1802 = vmatmul.bf16.gmra.mxu2 %v1702_v41 }
 0x412   :  { %v1768_v4 = vpop.f32.mrf.mxu2 }
 0x413   :  { %v1808_v58 = vpack.c.bf16 %v1768_v4, %v1768_v4 }
 0x415   :  { %v1829_v8 = vunpack.c.l.bf16 %v1808_v58 }
 0x417   :  { %v1846_v16 = vadd.f32 %v3425_v10, %v1829_v8 }
 0x419   :  { %v1894_v13 = vmax.f32 %v1846_v16, 0.0 }
 0x41a   :  { %v1770_v11 = vpop.f32.mrf.mxu2 }
 0x41b   :  { %v1809_v12 = vpack.c.bf16 %v1770_v11, %v1770_v11 }
 0x41d   :  { %v1830_v20 = vunpack.c.l.bf16 %v1809_v12 }
 0x41f   :  { %v1847_v18 = vadd.f32 %v3425_v10, %v1830_v20 }
 0x421   :  { %v1895_v23 = vmax.f32 %v1847_v18, 0.0 }
 0x422   :  { %v1773_v24 = vpop.f32.mrf.mxu2 }
 0x423   :  { %v1910_v26 = vpack.c.bf16 %v1895_v23, %v1894_v13  ;;  %v1810_v22 = vpack.c.bf16 %v1773_v24, %v1773_v24 }
 0x425   :  { %2667 = vmatmul.msk.bf16.vlgmr.msra.gmra.mxu3 %vm688_vm3, %v1910_v26  ;;  %v1831_v27 = vunpack.c.l.bf16 %v1810_v22 }
 0x427   :  { %v1848_v61 = vadd.f32 %v3425_v10, %v1831_v27 }
 0x429   :  { %v1896_v36 = vmax.f32 %v1848_v61, 0.0 }
 0x42a   :  { %v1775_v43 = vpop.f32.mrf.mxu2 }
 0x42b   :  { %v1811_v32 = vpack.c.bf16 %v1775_v43, %v1775_v43 }
 0x42d   :  { %v1832_v2 = vunpack.c.l.bf16 %v1811_v32 }
 0x42f   :  { %v1849_v3 = vadd.f32 %v3425_v10, %v1832_v2 }
 0x431   :  { %v1897_v37 = vmax.f32 %v1849_v3, 0.0 }
 0x432   :  { %v1778_v6 = vpop.f32.mrf.mxu2 }
 0x433   :  { %v1911_v39 = vpack.c.bf16 %v1897_v37, %v1896_v36  ;;  %v1812_v14 = vpack.c.bf16 %v1778_v6, %v1778_v6 }
 0x435   :  { %2668 = vmatmul.msk.bf16.gmra.mxu3 %vm688_vm3, %v1911_v39  ;;  %v1833_v47 = vunpack.c.l.bf16 %v1812_v14 }
 0x437   :  { %v1850_v50 = vadd.f32 %v3425_v10, %v1833_v47 }
 0x439   :  { %v1898_v4 = vmax.f32 %v1850_v50, 0.0 }
 0x43a   :  { %v1780_v57 = vpop.f32.mrf.mxu2 }
 0x43b   :  { %v1813_v41 = vpack.c.bf16 %v1780_v57, %v1780_v57 }
 0x43d   :  { %v1834_v54 = vunpack.c.l.bf16 %v1813_v41 }
 0x43f   :  { %v1851_v0 = vadd.f32 %v3425_v10, %v1834_v54 }
 0x441   :  { %v1899_v58 = vmax.f32 %v1851_v0, 0.0 }
 0x442   :  { %v1783_v7 = vpop.f32.mrf.mxu2 }
 0x443   :  { %v1912_v8 = vpack.c.bf16 %v1899_v58, %v1898_v4  ;;  %v1814_v11 = vpack.c.bf16 %v1783_v7, %v1783_v7 }
 0x445   :  { %2669 = vmatmul.msk.bf16.gmra.mxu3 %vm688_vm3, %v1912_v8  ;;  %v1835_v12 = vunpack.c.l.bf16 %v1814_v11 }
 0x447   :  { %v1852_v18 = vadd.f32 %v3425_v10, %v1835_v12 }
 0x449   :  { %v1900_v24 = vmax.f32 %v1852_v18, 0.0 }
 0x44a   :  { %v1785_v16 = vpop.f32.mrf.mxu2 }
 0x44b   :  { %v1815_v20 = vpack.c.bf16 %v1785_v16, %v1785_v16 }
 0x44d   :  { %v1836_v13 = vunpack.c.l.bf16 %v1815_v20 }
 0x44f   :  { %v1853_v23 = vadd.f32 %v3425_v10, %v1836_v13 }
 0x451   :  { %v1901_v26 = vmax.f32 %v1853_v23, 0.0 }
 0x452   :  { %v1788_v22 = vpop.f32.mrf.mxu2 }
 0x453   :  { %v1913_v27 = vpack.c.bf16 %v1901_v26, %v1900_v24  ;;  %v1816_v43 = vpack.c.bf16 %v1788_v22, %v1788_v22 }
 0x455   :  { %2670 = vmatmul.msk.bf16.gmra.mxu3 %vm688_vm3, %v1913_v27  ;;  %v1837_v32 = vunpack.c.l.bf16 %v1816_v43 }
 0x457   :  { %v1854_v3 = vadd.f32 %v3425_v10, %v1837_v32 }
 0x459   :  { %v1902_v6 = vmax.f32 %v1854_v3, 0.0 }
 0x45a   :  { %v1790_v61 = vpop.f32.mrf.mxu2 }
 0x45b   :  { %v1817_v2 = vpack.c.bf16 %v1790_v61, %v1790_v61 }
 0x45d   :  { %v1838_v36 = vunpack.c.l.bf16 %v1817_v2 }
 0x45f   :  { %v1855_v37 = vadd.f32 %v3425_v10, %v1838_v36 }
 0x461   :  { %v1903_v39 = vmax.f32 %v1855_v37, 0.0 }
 0x462   :  { %v1793_v14 = vpop.f32.mrf.mxu2 }
 0x463   :  { %v1914_v47 = vpack.c.bf16 %v1903_v39, %v1902_v6  ;;  %v1818_v57 = vpack.c.bf16 %v1793_v14, %v1793_v14 }
 0x465   :  { %2671 = vmatmul.msk.bf16.gmra.mxu3 %vm688_vm3, %v1914_v47  ;;  %v1839_v41 = vunpack.c.l.bf16 %v1818_v57 }
 0x467   :  { %v1856_v0 = vadd.f32 %v3425_v10, %v1839_v41  ;;  %v3454_v41 = vld [vmem:[%s3764_s17] ss:$0 sm:$0xff]  ;;  %s2821_s17 = smov [#allocation2]  }
 0x468   :  { %s2401_s12 = sshll.u32 %s2821_s17, 4  ;;  %s2402_s12 = int_to_ptr.vmem [resolvable:$true] %s2401_s12 }
 0x469   :  { %v1904_v7 = vmax.f32 %v1856_v0, 0.0 }
 0x46a   :  { %v1795_v50 = vpop.f32.mrf.mxu2 }
 0x46b   :  { %v1819_v54 = vpack.c.bf16 %v1795_v50, %v1795_v50 }
 0x46d   :  { %v1840_v4 = vunpack.c.l.bf16 %v1819_v54 }
 0x46f   :  { %v1857_v58 = vadd.f32 %v3425_v10, %v1840_v4 }
 0x471   :  { %v1905_v8 = vmax.f32 %v1857_v58, 0.0 }
 0x472   :  { %v1798_v11 = vpop.f32.mrf.mxu2 }
 0x473   :  { %v1915_v12 = vpack.c.bf16 %v1905_v8, %v1904_v7  ;;  %v1820_v16 = vpack.c.bf16 %v1798_v11, %v1798_v11 }
 0x475   :  { %2672 = vmatmul.msk.bf16.gmra.mxu3 %vm688_vm3, %v1915_v12  ;;  %v1841_v20 = vunpack.c.l.bf16 %v1820_v16 }
 0x477   :  { %v1858_v23 = vadd.f32 %v3425_v10, %v1841_v20 }
 0x479   :  { %v1906_v22 = vmax.f32 %v1858_v23, 0.0 }
 0x47a   :  { %v1800_v18 = vpop.f32.mrf.mxu2 }
 0x47b   :  { %v1821_v13 = vpack.c.bf16 %v1800_v18, %v1800_v18 }
 0x47d   :  { %v1842_v24 = vunpack.c.l.bf16 %v1821_v13 }
 0x47f   :  { %v1859_v26 = vadd.f32 %v3425_v10, %v1842_v24 }
 0x481   :  { %v1907_v27 = vmax.f32 %v1859_v26, 0.0 }
 0x482   :  { %v1803_v43 = vpop.f32.mrf.mxu2 }
 0x483   :  { %v1916_v32 = vpack.c.bf16 %v1907_v27, %v1906_v22  ;;  %v1822_v61 = vpack.c.bf16 %v1803_v43, %v1803_v43 }
 0x485   :  { %2673 = vmatmul.msk.bf16.gmra.mxu3 %vm688_vm3, %v1916_v32  ;;  %v1843_v2 = vunpack.c.l.bf16 %v1822_v61 }
 0x487   :  { %v1860_v37 = vadd.f32 %v3425_v10, %v1843_v2 }
 0x489   :  { %v1908_v14 = vmax.f32 %v1860_v37, 0.0 }
 0x48a   :  { %v1805_v3 = vpop.f32.mrf.mxu2 }
 0x48b   :  { %v1823_v36 = vpack.c.bf16 %v1805_v3, %v1805_v3 }
 0x48d   :  { %v1844_v6 = vunpack.c.l.bf16 %v1823_v36 }
 0x48f   :  { %v1861_v39 = vadd.f32 %v3425_v10, %v1844_v6 }
 0x491   :  { %v1909_v47 = vmax.f32 %v1861_v39, 0.0 }
 0x493   :  { %v1917_v57 = vpack.c.bf16 %v1909_v47, %v1908_v14 }
 0x495   :  { %2674 = vmatmul.msk.bf16.gmra.mxu3 %vm688_vm3, %v1917_v57 }
 0x4a8   :  { %v1994_v50 = vpop.f32.mrf.mxu3 }
 0x4a9   :  { %v3457_v54 = vadd.f32 %v3454_v41, %v1994_v50 }
 0x4ab   :  { %v2034_v0 = vmax.f32 %v3457_v54, 0.0 }
 0x4ad   :  { %v2050_v10 = vsel %vm614_vm1, %v2034_v0, -inf }
 0x4ae   :  { %2051 = vmax.xlane.f32.xlu0 %v2050_v10 }
 0x4b0   :  { %v1996_v4 = vpop.f32.mrf.mxu3 }
 0x4b1   :  { %v3464_v58 = vadd.f32 %v3454_v41, %v1996_v4 }
 0x4b3   :  { %v2035_v7 = vmax.f32 %v3464_v58, 0.0 }
 0x4b5   :  { %v2053_v8 = vsel %vm614_vm1, %v2035_v7, -inf }
 0x4b6   :  { %2054 = vmax.xlane.f32.xlu1 %v2053_v8 }
 0x4b8   :  { %v1999_v11 = vpop.f32.mrf.mxu3 }
 0x4b9   :  { %v3471_v12 = vadd.f32 %v3454_v41, %v1999_v11 }
 0x4bb   :  { %v2036_v16 = vmax.f32 %v3471_v12, 0.0 }
 0x4bd   :  { %v2056_v20 = vsel %vm614_vm1, %v2036_v16, -inf }
 0x4be   :  { %2057 = vmax.xlane.f32.xlu2 %v2056_v20 }
 0x4c0   :  { %v2001_v18 = vpop.f32.mrf.mxu3 }
 0x4c1   :  { %v3478_v13 = vadd.f32 %v3454_v41, %v2001_v18 }
 0x4c3   :  { %v2037_v23 = vmax.f32 %v3478_v13, 0.0 }
 0x4c5   :  { %v2059_v24 = vsel %vm614_vm1, %v2037_v23, -inf }
 0x4c6   :  { %2060 = vmax.xlane.f32.xlu2 %v2059_v24 }
 0x4c8   :  { %v2004_v26 = vpop.f32.mrf.mxu3 }
 0x4c9   :  { %v3485_v22 = vadd.f32 %v3454_v41, %v2004_v26 }
 0x4cb   :  { %v2038_v27 = vmax.f32 %v3485_v22, 0.0 }
 0x4cd   :  { %v2062_v43 = vsel %vm614_vm1, %v2038_v27, -inf }
 0x4ce   :  { %2063 = vmax.xlane.f32.xlu2 %v2062_v43 }
 0x4d0   :  { %v2006_v32 = vpop.f32.mrf.mxu3 }
 0x4d1   :  { %v3492_v61 = vadd.f32 %v3454_v41, %v2006_v32 }
 0x4d3   :  { %v2039_v2 = vmax.f32 %v3492_v61, 0.0 }
 0x4d5   :  { %v2065_v3 = vsel %vm614_vm1, %v2039_v2, -inf }
 0x4d6   :  { %2066 = vmax.xlane.f32.xlu2 %v2065_v3 }
 0x4d8   :  { %v2009_v36 = vpop.f32.mrf.mxu3 }
 0x4d9   :  { %v3499_v37 = vadd.f32 %v3454_v41, %v2009_v36 }
 0x4db   :  { %v2040_v6 = vmax.f32 %v3499_v37, 0.0 }
 0x4dd   :  { %v2068_v39 = vsel %vm614_vm1, %v2040_v6, -inf }
 0x4de   :  { %2069 = vmax.xlane.f32.xlu2 %v2068_v39 }
 0x4e0   :  { %v2011_v14 = vpop.f32.mrf.mxu3 }
 0x4e1   :  { %v3517_v20 = vadd.f32 %v3454_v41, %v2011_v14 }
 0x4e3   :  { %v2041_v26 = vmax.f32 %v3517_v20, 0.0 }
 0x4e5   :  { %v2071_v3 = vsel %vm614_vm1, %v2041_v26, -inf }
 0x4e8   :  { %v2014_v47 = vpop.f32.mrf.mxu3 }
 0x4e9   :  { %v3506_v57 = vadd.f32 %v3454_v41, %v2014_v47 }
 0x4eb   :  { %v2042_v50 = vmax.f32 %v3506_v57, 0.0 }
 0x4ed   :  { %v2074_v10 = vsel %vm614_vm1, %v2042_v50, -inf }
 0x4ee   :  { %2075 = vmax.xlane.f32.xlu1 %v2074_v10 }
 0x4f0   :  { %v2016_v4 = vpop.f32.mrf.mxu3 }
 0x4f1   :  { %v3513_v8 = vadd.f32 %v3454_v41, %v2016_v4 }
 0x4f3   :  { %v2043_v11 = vmax.f32 %v3513_v8, 0.0 }
 0x4f5   :  { %v2077_v18 = vsel %vm614_vm1, %v2043_v11, -inf }
 0x4f6   :  { %2078 = vmax.xlane.f32.xlu2 %v2077_v18 }
 0x4f8   :  { %v2019_v24 = vpop.f32.mrf.mxu3 }
 0x4f9   :  { %v3524_v43 = vadd.f32 %v3454_v41, %v2019_v24 }
 0x4fb   :  { %v2044_v32 = vmax.f32 %v3524_v43, 0.0 }
 0x4fd   :  { %v2080_v36 = vsel %vm614_vm1, %v2044_v32, -inf }
 0x4fe   :  { %2072 = vmax.xlane.f32.xlu2 %v2071_v3  ;;  %2081 = vmax.xlane.f32.xlu1 %v2080_v36 }
 0x500   :  { %v2021_v39 = vpop.f32.mrf.mxu3 }
 0x501   :  { %v3534_v14 = vadd.f32 %v3454_v41, %v2021_v39 }
 0x503   :  { %v2045_v47 = vmax.f32 %v3534_v14, 0.0 }
 0x505   :  { %v2083_v10 = vsel %vm614_vm1, %v2045_v47, -inf }
 0x506   :  { %2084 = vmax.xlane.f32.xlu1 %v2083_v10 }
 0x508   :  { %v2024_v4 = vpop.f32.mrf.mxu3 }
 0x509   :  { %v3541_v18 = vadd.f32 %v3454_v41, %v2024_v4 }
 0x50b   :  { %v2046_v24 = vmax.f32 %v3541_v18, 0.0 }
 0x50d   :  { %v2086_v3 = vsel %vm614_vm1, %v2046_v24, -inf }
 0x50e   :  { %2087 = vmax.xlane.f32.xlu1 %v2086_v3 }
 0x510   :  { %v2026_v36 = vpop.f32.mrf.mxu3 }
 0x511   :  { %v3548_v39 = vadd.f32 %v3454_v41, %v2026_v36 }
 0x513   :  { %v2047_v53 = vmax.f32 %v3548_v39, 0.0 }
 0x515   :  { %v2089_v10 = vsel %vm614_vm1, %v2047_v53, -inf }
 0x516   :  { %2090 = vmax.xlane.f32.xlu1 %v2089_v10 }
 0x518   :  { %v2029_v4 = vpop.f32.mrf.mxu3 }
 0x519   :  { %v3555_v29 = vadd.f32 %v3454_v41, %v2029_v4 }
 0x51b   :  { %v2048_v60 = vmax.f32 %v3555_v29, 0.0 }
 0x51d   :  { %v2092_v3 = vsel %vm614_vm1, %v2048_v60, -inf }
 0x51e   :  { %2093 = vmax.xlane.f32.xlu1 %v2092_v3 }
 0x520   :  { %v2031_v36 = vpop.f32.mrf.mxu3 }
 0x521   :  { %v3562_v49 = vadd.f32 %v3454_v41, %v2031_v36  ;;  %v2052_v30 = vpop.xlane.xlu0 %2051 }
 0x522   :  { %v2098_v56 = vsub.f32 %v2034_v0, %v2052_v30 }
 0x523   :  { %v2049_v10 = vmax.f32 %v3562_v49, 0.0 }
 0x524   :  { %v2114_v38 = vmul.f32 1.442695, %v2098_v56 }
 0x525   :  { %v2095_v4 = vsel %vm614_vm1, %v2049_v10, -inf }
 0x526   :  { %2730 = vpow2.f32 %v2114_v38  ;;  %2096 = vmax.xlane.f32.xlu0 %v2095_v4 }
 0x529   :  { %v2055_v34 = vpop.xlane.xlu1 %2054 }
 0x52a   :  { %v2099_v3 = vsub.f32 %v2035_v7, %v2055_v34 }
 0x52c   :  { %v3572_v5 = vpop.eup %2730  ;;  %v2116_v41 = vmul.f32 1.442695, %v2099_v3 }
 0x52d   :  { %v2146_v54 = vsel %vm614_vm1, %v3572_v5, 0.0 }
 0x52e   :  { %2732 = vpow2.f32 %v2116_v41  ;;  %2147 = vadd.xlane.f32.xlu1 %v2146_v54 }
 0x531   :  { %v2058_v30 = vpop.xlane.xlu2 %2057 }
 0x532   :  { %v2100_v56 = vsub.f32 %v2036_v16, %v2058_v30 }
 0x534   :  { %v3578_v0 = vpop.eup %2732  ;;  %v2118_v38 = vmul.f32 1.442695, %v2100_v56 }
 0x535   :  { %v2149_v36 = vsel %vm614_vm1, %v3578_v0, 0.0 }
 0x536   :  { %2734 = vpow2.f32 %v2118_v38  ;;  %2150 = vadd.xlane.f32.xlu2 %v2149_v36 }
 0x539   :  { %v2061_v34 = vpop.xlane.xlu2 %2060 }
 0x53a   :  { %v2101_v58 = vsub.f32 %v2037_v23, %v2061_v34 }
 0x53c   :  { %v3584_v7 = vpop.eup %2734  ;;  %v2120_v4 = vmul.f32 1.442695, %v2101_v58 }
 0x53d   :  { %v2152_v3 = vsel %vm614_vm1, %v3584_v7, 0.0 }
 0x53e   :  { %2736 = vpow2.f32 %v2120_v4  ;;  %2153 = vadd.xlane.f32.xlu2 %v2152_v3 }
 0x541   :  { %v2064_v12 = vpop.xlane.xlu2 %2063 }
 0x542   :  { %v2102_v16 = vsub.f32 %v2038_v27, %v2064_v12 }
 0x544   :  { %v3590_v41 = vpop.eup %2736  ;;  %v2122_v54 = vmul.f32 1.442695, %v2102_v16 }
 0x545   :  { %v2155_v30 = vsel %vm614_vm1, %v3590_v41, 0.0 }
 0x546   :  { %2738 = vpow2.f32 %v2122_v54  ;;  %2156 = vadd.xlane.f32.xlu1 %v2155_v30 }
 0x549   :  { %v2067_v13 = vpop.xlane.xlu2 %2066 }
 0x54a   :  { %v2103_v23 = vsub.f32 %v2039_v2, %v2067_v13 }
 0x54c   :  { %v3596_v56 = vpop.eup %2738  ;;  %v2124_v38 = vmul.f32 1.442695, %v2103_v23 }
 0x54d   :  { %v2158_v36 = vsel %vm614_vm1, %v3596_v56, 0.0 }
 0x54e   :  { %2740 = vpow2.f32 %v2124_v38  ;;  %2159 = vadd.xlane.f32.xlu0 %v2158_v36 }
 0x551   :  { %v2070_v22 = vpop.xlane.xlu2 %2069 }
 0x552   :  { %v2104_v27 = vsub.f32 %v2040_v6, %v2070_v22 }
 0x554   :  { %v3602_v34 = vpop.eup %2740  ;;  %v2126_v58 = vmul.f32 1.442695, %v2104_v27 }
 0x555   :  { %v2161_v4 = vsel %vm614_vm1, %v3602_v34, 0.0 }
 0x556   :  { %2742 = vpow2.f32 %v2126_v58  ;;  %2162 = vadd.xlane.f32.xlu2 %v2161_v4 }
 0x55c   :  { %v3606_v61 = vpop.eup %2742 }
 0x55d   :  { %v2164_v2 = vsel %vm614_vm1, %v3606_v61, 0.0 }
 0x55e   :  { %2165 = vadd.xlane.f32.xlu1 %v2164_v2 }
 0x561   :  { %v2076_v3 = vpop.xlane.xlu1 %2075 }
 0x562   :  { %v2106_v12 = vsub.f32 %v2042_v50, %v2076_v3 }
 0x564   :  { %v2130_v37 = vmul.f32 1.442695, %v2106_v12 }
 0x566   :  { %2744 = vpow2.f32 %v2130_v37 }
 0x569   :  { %v2079_v6 = vpop.xlane.xlu2 %2078 }
 0x56a   :  { %v2107_v16 = vsub.f32 %v2043_v11, %v2079_v6 }
 0x56c   :  { %v3614_v54 = vpop.eup %2744  ;;  %v2132_v30 = vmul.f32 1.442695, %v2107_v16 }
 0x56d   :  { %v2170_v13 = vsel %vm614_vm1, %v3614_v54, 0.0 }
 0x56e   :  { %2746 = vpow2.f32 %v2132_v30  ;;  %2171 = vadd.xlane.f32.xlu0 %v2170_v13 }
 0x571   :  { %v2082_v23 = vpop.xlane.xlu1 %2081  ;;  %v2073_v14 = vpop.xlane.xlu2 %2072 }
 0x572   :  { %v2108_v38 = vsub.f32 %v2044_v32, %v2082_v23  ;;  %v2105_v6 = vsub.f32 %v2041_v26, %v2073_v14 }
 0x574   :  { %v3620_v57 = vpop.eup %2746  ;;  %v2134_v50 = vmul.f32 1.442695, %v2108_v38  ;;  %v2128_v16 = vmul.f32 1.442695, %v2105_v6 }
 0x575   :  { %v2173_v36 = vsel %vm614_vm1, %v3620_v57, 0.0 }
 0x576   :  { %2174 = vadd.xlane.f32.xlu1 %v2173_v36  ;;  %2748 = vpow2.f32 %v2134_v50 }
 0x579   :  { %v2085_v8 = vpop.xlane.xlu1 %2084 }
 0x57a   :  { %v2109_v11 = vsub.f32 %v2045_v47, %v2085_v8 }
 0x57c   :  { %v2136_v22 = vmul.f32 1.442695, %v2109_v11  ;;  %v3626_v27 = vpop.eup %2748 }
 0x57d   :  { %v2176_v43 = vsel %vm614_vm1, %v3626_v27, 0.0 }
 0x57e   :  { %2750 = vpow2.f32 %v2136_v22  ;;  %2177 = vadd.xlane.f32.xlu0 %v2176_v43 }
 0x581   :  { %v2088_v32 = vpop.xlane.xlu1 %2087 }
 0x582   :  { %v2110_v58 = vsub.f32 %v2046_v24, %v2088_v32 }
 0x584   :  { %v3632_v4 = vpop.eup %2750  ;;  %v2138_v2 = vmul.f32 1.442695, %v2110_v58 }
 0x585   :  { %v2179_v3 = vsel %vm614_vm1, %v3632_v4, 0.0 }
 0x586   :  { %2752 = vpow2.f32 %v2138_v2  ;;  %2180 = vadd.xlane.f32.xlu2 %v2179_v3 }
 0x589   :  { %v2091_v47 = vpop.xlane.xlu1 %2090 }
 0x58a   :  { %v2111_v12 = vsub.f32 %v2047_v53, %v2091_v47 }
 0x58c   :  { %v3638_v37 = vpop.eup %2752  ;;  %v2140_v18 = vmul.f32 1.442695, %v2111_v12 }
 0x58d   :  { %v2182_v24 = vsel %vm614_vm1, %v3638_v37, 0.0 }
 0x58e   :  { %2754 = vpow2.f32 %v2140_v18  ;;  %2183 = vadd.xlane.f32.xlu1 %v2182_v24 }
 0x58f   :  { %2756 = vpow2.f32 %v2128_v16 }
 0x591   :  { %v2094_v30 = vpop.xlane.xlu1 %2093 }
 0x592   :  { %v2112_v13 = vsub.f32 %v2048_v60, %v2094_v30 }
 0x594   :  { %v3646_v23 = vpop.eup %2754  ;;  %v2142_v53 = vmul.f32 1.442695, %v2112_v13 }
 0x595   :  { %v2185_v39 = vsel %vm614_vm1, %v3646_v23, 0.0  ;;  %v3650_v26 = vpop.eup %2756 }
 0x596   :  { %2758 = vpow2.f32 %v2142_v53  ;;  %2186 = vadd.xlane.f32.xlu0 %v2185_v39  ;;  %v2167_v60 = vsel %vm614_vm1, %v3650_v26, 0.0 }
 0x599   :  { %v2097_v20 = vpop.xlane.xlu0 %2096 }
 0x59a   :  { %v2113_v38 = vsub.f32 %v2049_v10, %v2097_v20 }
 0x59c   :  { %v3654_v50 = vpop.eup %2758  ;;  %v2144_v36 = vmul.f32 1.442695, %v2113_v38 }
 0x59d   :  { %v2188_v29 = vsel %vm614_vm1, %v3654_v50, 0.0 }
 0x59e   :  { %2760 = vpow2.f32 %v2144_v36  ;;  %2168 = vadd.xlane.f32.xlu0 %v2167_v60  ;;  %2189 = vadd.xlane.f32.xlu2 %v2188_v29 }
 0x5a1   :  { %v2148_v10 = vpop.xlane.xlu1 %2147 }
 0x5a4   :  { %v3660_v8 = vpop.eup %2760 }
 0x5a5   :  { %v2191_v11 = vsel %vm614_vm1, %v3660_v8, 0.0 }
 0x5a6   :  { %2192 = vadd.xlane.f32.xlu1 %v2191_v11 }
 0x5a9   :  { %v2151_v49 = vpop.xlane.xlu2 %2150 }
 0x5aa   :  { %2762 = vrcp.f32 %v2151_v49 }
 0x5ab   :  { %2764 = vrcp.f32 %v2148_v10 }
 0x5b0   :  { %v2763_v32 = vpop.eup %2762 }
 0x5b1   :  { %v2154_v22 = vpop.xlane.xlu2 %2153  ;;  %v2765_v2 = vpop.eup %2764  ;;  %v2211_v3 = vmul.f32 %v2763_v32, %v3578_v0 }
 0x5b2   :  { %2766 = vrcp.f32 %v2154_v22  ;;  %v2210_v12 = vmul.f32 %v2765_v2, %v3572_v5 }
 0x5b3   :  { %v2227_v6 = vmul.f32 %v2211_v3, %v1599_v19 }
 0x5b4   :  { %v2226_v13 = vmul.f32 %v2210_v12, %v1598_v59 }
 0x5b5   :  { %v2249_v53 = vsel %vm614_vm1, %v2227_v6, 0.0 }
 0x5b6   :  { %v2250_v19 = vrot.slane %v2249_v53, 4 }
 0x5b8   :  { %v2767_v47 = vpop.eup %2766  ;;  %v2251_v60 = vadd.f32 %v2250_v19, %v2249_v53  ;;  %v3783_v19 = vunpack.c.l.bf16 %v3368_v52 }
 0x5b9   :  { %v2157_v43 = vpop.xlane.xlu1 %2156  ;;  %v2212_v18 = vmul.f32 %v2767_v47, %v3584_v7  ;;  %v2242_v7 = vsel %vm614_vm1, %v2226_v13, 0.0 }
 0x5ba   :  { %2768 = vrcp.f32 %v2157_v43  ;;  %v2243_v36 = vrot.slane %v2242_v7, 4 }
 0x5bb   :  { %v2228_v0 = vmul.f32 %v2212_v18, %v1600_v55 }
 0x5bc   :  { %v2244_v42 = vadd.f32 %v2243_v36, %v2242_v7  ;;  %v3787_v36 = vunpack.c.l.bf16 %v3395_v1  ;;  %v3788_v1 = vunpack.c.l.bf16 %v3403_v40 }
 0x5bd   :  { %v2256_v20 = vsel %vm614_vm1, %v2228_v0, 0.0 }
 0x5be   :  { %v2257_v29 = vrot.slane %v2256_v20, 4  ;;  %v2245_v47 = vrot.slane %v2244_v42, 2 }
 0x5c0   :  { %v2769_v30 = vpop.eup %2768  ;;  %v2258_v22 = vadd.f32 %v2257_v29, %v2256_v20  ;;  %v2246_v0 = vadd.f32 %v2245_v47, %v2244_v42  ;;  %v3784_v20 = vunpack.c.l.bf16 %v3379_v25 }
 0x5c1   :  { %v2160_v58 = vpop.xlane.xlu0 %2159  ;;  %v2213_v17 = vmul.f32 %v2769_v30, %v3590_v41 }
 0x5c2   :  { %2770 = vrcp.f32 %v2160_v58  ;;  %v2259_v6 = vrot.slane %v2258_v22, 2 }
 0x5c3   :  { %v2229_v59 = vmul.f32 %v2213_v17, %v1601_v48  ;;  %v2252_v48 = vrot.slane %v2251_v60, 2 }
 0x5c5   :  { %v2253_v12 = vadd.f32 %v2252_v48, %v2251_v60 }
 0x5c8   :  { %v2771_v5 = vpop.eup %2770 }
 0x5c9   :  { %v2163_v16 = vpop.xlane.xlu2 %2162  ;;  %v2214_v38 = vmul.f32 %v2771_v5, %v3596_v56  ;;  %v2263_v56 = vsel %vm614_vm1, %v2229_v59, 0.0  ;;  %v2260_v5 = vadd.f32 %v2259_v6, %v2258_v22 }
 0x5ca   :  { %2772 = vrcp.f32 %v2163_v16  ;;  %v2264_v58 = vrot.slane %v2263_v56, 4 }
 0x5cb   :  { %v2230_v11 = vmul.f32 %v2214_v38, %v1602_v21  ;;  %v2261_v52 = vrot.slane %v2260_v5, 1 }
 0x5cc   :  { %v2265_v30 = vadd.f32 %v2264_v58, %v2263_v56 }
 0x5cd   :  { %v2270_v2 = vsel %vm614_vm1, %v2230_v11, 0.0 }
 0x5ce   :  { %v2271_v18 = vrot.slane %v2270_v2, 4  ;;  %v2266_v44 = vrot.slane %v2265_v30, 2 }
 0x5d0   :  { %v2773_v55 = vpop.eup %2772 }
 0x5d1   :  { %v2166_v14 = vpop.xlane.xlu1 %2165  ;;  %v2215_v10 = vmul.f32 %v2773_v55, %v3602_v34 }
 0x5d2   :  { %2774 = vrcp.f32 %v2166_v14 }
 0x5d3   :  { %v2231_v9 = vmul.f32 %v2215_v10, %v1603_v31 }
 0x5d8   :  { %v2775_v49 = vpop.eup %2774 }
 0x5d9   :  { %v2216_v3 = vmul.f32 %v2775_v49, %v3606_v61  ;;  %v2277_v61 = vsel %vm614_vm1, %v2231_v9, 0.0 }
 0x5db   :  { %v2232_v13 = vmul.f32 %v2216_v3, %v1604_v62  ;;  %v2278_v62 = vrot.slane %v2277_v61, 4 }
 0x5dd   :  { %v2279_v10 = vadd.f32 %v2278_v62, %v2277_v61 }
 0x5e1   :  { %v2172_v24 = vpop.xlane.xlu0 %2171 }
 0x5e2   :  { %2776 = vrcp.f32 %v2172_v24 }
 0x5e8   :  { %v2777_v43 = vpop.eup %2776 }
 0x5e9   :  { %v2175_v39 = vpop.xlane.xlu1 %2174  ;;  %v2218_v28 = vmul.f32 %v2777_v43, %v3614_v54  ;;  %v3785_v54 = vunpack.c.l.bf16 %v3363_v33  ;;  %v2267_v33 = vadd.f32 %v2266_v44, %v2265_v30  ;;  %v3789_v44 = vunpack.c.l.bf16 %v3355_v15 }
 0x5ea   :  { %2778 = vrcp.f32 %v2175_v39  ;;  %v2254_v39 = vrot.slane %v2253_v12, 1 }
 0x5eb   :  { %v2268_v6 = vrot.slane %v2267_v33, 1 }
 0x5ec   :  { %v2255_v55 = vadd.f32 %v2254_v39, %v2253_v12 }
 0x5f0   :  { %v2779_v32 = vpop.eup %2778 }
 0x5f1   :  { %v2178_v51 = vpop.xlane.xlu0 %2177  ;;  %v2219_v24 = vmul.f32 %v2779_v32, %v3620_v57  ;;  %v2272_v57 = vadd.f32 %v2271_v18, %v2270_v2  ;;  %v2262_v32 = vadd.f32 %v2261_v52, %v2260_v5 }
 0x5f2   :  { %2780 = vrcp.f32 %v2178_v51  ;;  %v3786_v51 = vunpack.c.l.bf16 %v3384_v46 }
 0x5f3   :  { %v2235_v7 = vmul.f32 %v2219_v24, %v3783_v19  ;;  %v2273_v29 = vrot.slane %v2272_v57, 2 }
 0x5f5   :  { %v2305_v25 = vsel %vm614_vm1, %v2235_v7, 0.0  ;;  %v2274_v2 = vadd.f32 %v2273_v29, %v2272_v57  ;;  %v2269_v57 = vadd.f32 %v2268_v6, %v2267_v33 }
 0x5f6   :  { %v2306_v58 = vrot.slane %v2305_v25, 4 }
 0x5f8   :  { %v2781_v14 = vpop.eup %2780 }
 0x5f9   :  { %v2181_v63 = vpop.xlane.xlu2 %2180  ;;  %v2220_v53 = vmul.f32 %v2781_v14, %v3626_v27  ;;  %v2284_v27 = vsel %vm614_vm1, %v2232_v13, 0.0 }
 0x5fa   :  { %2782 = vrcp.f32 %v2181_v63  ;;  %v2247_v63 = vrot.slane %v2246_v0, 1 }
 0x5fb   :  { %v2236_v38 = vmul.f32 %v2220_v53, %v3784_v20  ;;  %v2275_v53 = vrot.slane %v2274_v2, 1 }
 0x5fc   :  { %v2248_v43 = vadd.f32 %v2247_v63, %v2246_v0 }
 0x5fd   :  { %v2312_v46 = vsel %vm614_vm1, %v2236_v38, 0.0  ;;  %v3790_v38 = vunpack.c.l.bf16 %v3411_v45 }
 0x5fe   :  { %v2313_v14 = vrot.slane %v2312_v46, 4  ;;  %v2371_v12 = vsel %vm2370_vm5, %v2255_v55, %v2248_v43 }
 0x5ff   :  { %v2373_v24 = vsel %vm2372_vm6, %v2262_v32, %v2371_v12  ;;  %v3791_v32 = vunpack.c.l.bf16 %v3415_v35 }
 0x600   :  { %v2783_v21 = vpop.eup %2782  ;;  %v2375_v52 = vsel %vm2374_vm7, %v2269_v57, %v2373_v24 }
 0x601   :  { %v2184_v41 = vpop.xlane.xlu1 %2183  ;;  %v2221_v31 = vmul.f32 %v2783_v21, %v3632_v4  ;;  %v2234_v4 = vmul.f32 %v2218_v28, %v3785_v54  ;;  %v2314_v28 = vadd.f32 %v2313_v14, %v2312_v46 }
 0x602   :  { %2784 = vrcp.f32 %v2184_v41  ;;  %v2285_v41 = vrot.slane %v2284_v27, 4 }
 0x603   :  { %v2237_v59 = vmul.f32 %v2221_v31, %v3786_v51  ;;  %v2298_v42 = vsel %vm614_vm1, %v2234_v4, 0.0  ;;  %v2276_v4 = vadd.f32 %v2275_v53, %v2274_v2  ;;  %v2315_v51 = vrot.slane %v2314_v28, 2 }
 0x604   :  { %v2286_v3 = vadd.f32 %v2285_v41, %v2284_v27  ;;  %v2299_v21 = vrot.slane %v2298_v42, 4 }
 0x605   :  { %v2319_v48 = vsel %vm614_vm1, %v2237_v59, 0.0 }
 0x606   :  { %v2320_v47 = vrot.slane %v2319_v48, 4  ;;  %v2287_v61 = vrot.slane %v2286_v3, 2  ;;  %v2300_v39 = vadd.f32 %v2299_v21, %v2298_v42 }
 0x608   :  { %v2785_v34 = vpop.eup %2784  ;;  %v2321_v5 = vadd.f32 %v2320_v47, %v2319_v48  ;;  %v2377_v48 = vsel %vm2376_vm8, %v2276_v4, %v2375_v52 }
 0x609   :  { %v2187_v16 = vpop.xlane.xlu0 %2186  ;;  %v2222_v17 = vmul.f32 %v2785_v34, %v3638_v37  ;;  %v2280_v34 = vrot.slane %v2279_v10, 2 }
 0x60a   :  { %2786 = vrcp.f32 %v2187_v16  ;;  %v2307_v16 = vadd.f32 %v2306_v58, %v2305_v25 }
 0x60b   :  { %v2238_v60 = vmul.f32 %v2222_v17, %v3787_v36  ;;  %v2281_v19 = vadd.f32 %v2280_v34, %v2279_v10 }
 0x60c   :  { %v2308_v27 = vrot.slane %v2307_v16, 2 }
 0x60d   :  { %v2282_v15 = vrot.slane %v2281_v19, 1 }
 0x60e   :  { %v2309_v41 = vadd.f32 %v2308_v27, %v2307_v16 }
 0x610   :  { %v2787_v37 = vpop.eup %2786 }
 0x611   :  { %v2223_v11 = vmul.f32 %v2787_v37, %v3646_v23  ;;  %v2169_v49 = vpop.xlane.xlu0 %2168  ;;  %v2190_v56 = vpop.xlane.xlu2 %2189  ;;  %v2326_v23 = vsel %vm614_vm1, %v2238_v60, 0.0  ;;  %v2301_v37 = vrot.slane %v2300_v39, 2 }
 0x612   :  { %2788 = vrcp.f32 %v2169_v49  ;;  %v2327_v18 = vrot.slane %v2326_v23, 4  ;;  %v2316_v49 = vadd.f32 %v2315_v51, %v2314_v28 }
 0x613   :  { %v2239_v22 = vmul.f32 %v2223_v11, %v3788_v1  ;;  %2790 = vrcp.f32 %v2190_v56  ;;  %v2302_v10 = vadd.f32 %v2301_v37, %v2300_v39  ;;  %v2283_v1 = vadd.f32 %v2282_v15, %v2281_v19 }
 0x614   :  { %v2328_v7 = vadd.f32 %v2327_v18, %v2326_v23  ;;  %v2310_v23 = vrot.slane %v2309_v41, 1 }
 0x615   :  { %v2333_v9 = vsel %vm614_vm1, %v2239_v22, 0.0  ;;  %v2303_v47 = vrot.slane %v2302_v10, 1 }
 0x616   :  { %v2334_v30 = vrot.slane %v2333_v9, 4  ;;  %v2329_v36 = vrot.slane %v2328_v7, 2  ;;  %v2311_v24 = vadd.f32 %v2310_v23, %v2309_v41 }
 0x617   :  { %v2304_v28 = vadd.f32 %v2303_v47, %v2302_v10 }
 0x618   :  { %v2789_v40 = vpop.eup %2788  ;;  %v2335_v20 = vadd.f32 %v2334_v30, %v2333_v9  ;;  %v2330_v22 = vadd.f32 %v2329_v36, %v2328_v7  ;;  %v2317_v9 = vrot.slane %v2316_v49, 1 }
 0x619   :  { %v2791_v13 = vpop.eup %2790  ;;  %v2217_v31 = vmul.f32 %v2789_v40, %v3650_v26  ;;  %v2193_v0 = vpop.xlane.xlu1 %2192  ;;  %v2288_v26 = vadd.f32 %v2287_v61, %v2286_v3  ;;  %v2379_v40 = vsel %vm2378_vm9, %v2283_v1, %v2377_v48  ;;  %v2384_v57 = vsel %vm2370_vm5, %v2311_v24, %v2304_v28 }
 0x61a   :  { %v2224_v17 = vmul.f32 %v2791_v13, %v3654_v50  ;;  %2792 = vrcp.f32 %v2193_v0  ;;  %v2322_v50 = vrot.slane %v2321_v5, 2  ;;  %v2336_v45 = vrot.slane %v2335_v20, 2 }
 0x61b   :  { %v2233_v62 = vmul.f32 %v2217_v31, %v3789_v44  ;;  %v2289_v11 = vrot.slane %v2288_v26, 1  ;;  %v2331_v18 = vrot.slane %v2330_v22, 1  ;;  %v2318_v13 = vadd.f32 %v2317_v9, %v2316_v49 }
 0x61c   :  { %v2240_v54 = vmul.f32 %v2224_v17, %v3790_v38  ;;  %v2323_v46 = vadd.f32 %v2322_v50, %v2321_v5  ;;  %v2337_v2 = vadd.f32 %v2336_v45, %v2335_v20 }
 0x61d   :  { %v2291_v59 = vsel %vm614_vm1, %v2233_v62, 0.0  ;;  %v2290_v14 = vadd.f32 %v2289_v11, %v2288_v26  ;;  %v2332_v5 = vadd.f32 %v2331_v18, %v2330_v22  ;;  %v2385_v44 = vsel %vm2372_vm6, %v2318_v13, %v2384_v57 }
 0x61e   :  { %v2292_v63 = vrot.slane %v2291_v59, 4  ;;  %v2340_v55 = vsel %vm614_vm1, %v2240_v54, 0.0  ;;  %v2324_v12 = vrot.slane %v2323_v46, 1  ;;  %v2338_v35 = vrot.slane %v2337_v2, 1 }
 0x61f   :  { %v2341_v60 = vrot.slane %v2340_v55, 4  ;;  %v2381_v61 = vsel %vm2380_vm10, %v2290_v14, %v2379_v40 }
 0x620   :  { %v2793_v29 = vpop.eup %2792  ;;  %v2293_v25 = vadd.f32 %v2292_v63, %v2291_v59  ;;  %v2325_v31 = vadd.f32 %v2324_v12, %v2323_v46  ;;  %v2339_v19 = vadd.f32 %v2338_v35, %v2337_v2 }
 0x621   :  { %v2342_v56 = vadd.f32 %v2341_v60, %v2340_v55  ;;  %v2225_v33 = vmul.f32 %v2793_v29, %v3660_v8 }
 0x622   :  { %v2294_v42 = vrot.slane %v2293_v25, 2  ;;  %v2386_v27 = vsel %vm2374_vm7, %v2325_v31, %v2385_v44 }
 0x623   :  { %v2343_v43 = vrot.slane %v2342_v56, 2  ;;  %v2241_v58 = vmul.f32 %v2225_v33, %v3791_v32  ;;  %v2387_v38 = vsel %vm2376_vm8, %v2332_v5, %v2386_v27 }
 0x624   :  { %v2295_v3 = vadd.f32 %v2294_v42, %v2293_v25  ;;  %v2388_v4 = vsel %vm2378_vm9, %v2339_v19, %v2387_v38 }
 0x625   :  { %v2344_v21 = vadd.f32 %v2343_v43, %v2342_v56  ;;  %v2347_v8 = vsel %vm614_vm1, %v2241_v58, 0.0 }
 0x626   :  { %v2296_v6 = vrot.slane %v2295_v3, 1  ;;  %v2348_v34 = vrot.slane %v2347_v8, 4 }
 0x627   :  { %v2345_v53 = vrot.slane %v2344_v21, 1 }
 0x628   :  { %v2297_v16 = vadd.f32 %v2296_v6, %v2295_v3  ;;  %v2349_v30 = vadd.f32 %v2348_v34, %v2347_v8 }
 0x629   :  { %v2346_v62 = vadd.f32 %v2345_v53, %v2344_v21 }
 0x62a   :  { %v2350_v0 = vrot.slane %v2349_v30, 2  ;;  %v2383_v39 = vsel %vm2382_vm11, %v2297_v16, %v2381_v61 }
 0x62b   :  { %v2393_v17 = vsel %vm614_vm1, %v2383_v39, 0.0  ;;  %v2389_v26 = vsel %vm2380_vm10, %v2346_v62, %v2388_v4 }
 0x62c   :  { %v2351_v7 = vadd.f32 %v2350_v0, %v2349_v30  ;;  %2395 = vst [vmem:[#allocation2] sm:$0xff] %v2393_v17 }
 0x62e   :  { %v2352_v20 = vrot.slane %v2351_v7, 1 }
 0x630   :  { %v2353_v54 = vadd.f32 %v2352_v20, %v2351_v7 }
 0x632   :  { %v2390_v51 = vsel %vm2382_vm11, %v2353_v54, %v2389_v26 }
 0x633   :  { %v2394_v59 = vsel %vm614_vm1, %v2390_v51, 0.0 }
 0x634   :  { %2396 = vst [vmem:[#allocation2 + $0x8] sm:$0xff] %v2394_v59 }
 0x635   :  { %2409 = dma.vmem_to_hbm [thread:$0]  %s2402_s12, 256, %s2404_s27, [#allocation3], %s2822_s28, %s2822_s28, %s2823_s3  }
 0x636   :  { %2818 = dma.done.wait [#allocation3], 256  }
 0x637   :  { %2819 = vsyncadd [#allocation3], 4294967040 }
 0x638   :  { %2414 = vsyncpa [#allocation3], 1 }

</bundles_post_ra>
